<compile_context>
chip_gen: v7x
topology: tpu7x:2x2x1
jax: 0.10.0
libtpu: 0.0.40
codegen_flags: <defaults>
</compile_context>

<pallas_src>
import functools

import numpy as np

import jax
import jax.numpy as jnp
from jax.experimental import pallas as pl
from jax.experimental.pallas import tpu as pltpu


# ----------------------------------------------------------------------------
# Fused autoencoder kernel: 4 conv layers, all activations resident in VMEM.
# ----------------------------------------------------------------------------
def _ae_fused_kernel(x_ref, w_ref, b_ref, o_ref, *, cfgs):
    """Full 4-layer conv autoencoder in one invocation.

    x_ref : (N, C, H, W)  f32   raw NCHW input (no wrapper transpose).
    w_ref : (L, 3, 64, 64) bf16 per-layer / per-H-tap banded weight blocks
            (rows c-major: ci*W_in + w_in, cols c-major: co*W_out + w_out;
             W window, W zero-pad, W stride and 2x NN W-upsample folded in).
    b_ref : (L, 1, 64)    f32   bias rows matching the banded column order.
    o_ref : (N*H, C*W)    f32   last-layer output slab (c-major last dim).
    cfgs  : static tuple of (stride, h_upsample, relu) per layer.
    """
    n, cin, h0, w0 = x_ref.shape
    x = x_ref[...]                                         # (N, C, H, W) f32
    # NCHW -> (N, H, C*W) 64-lane slab (c-major last dim); one-time lane
    # concat of ~2 vregs of data instead of a separate XLA transpose launch.
    a = jnp.concatenate([x[:, c] for c in range(cin)], axis=-1)

    num_layers = len(cfgs)
    for li, (stride, upsample, relu) in enumerate(cfgs):
        n_, h, wc = a.shape
        if upsample:
            # Nearest-neighbour 2x along H only (the W-upsample is folded into
            # the banded weights): pure sublane interleave on the 64-lane slab.
            a = jnp.concatenate([a[:, :, None, :], a[:, :, None, :]], axis=2)
            h = 2 * h
            a = a.reshape(n_, h, wc)

        # Zero-pad H by one row on each side (leading/sublane-dim concat).
        zrow = jnp.zeros((n_, 1, wc), a.dtype)
        xp = jnp.concatenate([zrow, a, zrow], axis=1)      # (n, h+2, wc)
        hp = h + 2
        ho = (hp - 3) // stride + 1

        # Three H-taps: output row r reads padded rows stride*r + i, i in 0..2.
        if stride == 2:
            if hp % 2:                                     # keep parity reshape legal
                xp = jnp.concatenate([xp, zrow], axis=1)
                hp += 1
            xr = xp.reshape(n_, hp // 2, 2, wc)            # even/odd parity split
            even, odd = xr[:, :, 0], xr[:, :, 1]
            taps = (even[:, 0:ho], odd[:, 0:ho], even[:, 1:ho + 1])
        else:
            taps = (xp[:, 0:ho], xp[:, 1:ho + 1], xp[:, 2:ho + 2])

        # Three accumulating (M, 64) x (64, 64) MXU GEMMs -- no lane-axis
        # im2col concat.  Cast to bf16 only at the dot operands (v5e-friendly).
        acc = b_ref[li]                                    # (1, 64) f32, broadcasts
        for t, tap in enumerate(taps):
            lhs = tap.reshape(n_ * ho, wc).astype(jnp.bfloat16)
            acc = acc + jnp.dot(lhs, w_ref[li, t],
                                preferred_element_type=jnp.float32)
        if relu:
            acc = jnp.maximum(acc, 0.0)

        if li + 1 < num_layers:
            a = acc.reshape(n_, ho, acc.shape[-1])         # f32, 64-lane slab
        else:
            o_ref[...] = acc                               # (N*H, C*W) f32


# ----------------------------------------------------------------------------
# One-time (outside the jitted step) weight folding: banded per-tap blocks.
# ----------------------------------------------------------------------------
def prepare_kernel_params(params, input_width):
    """Fold each 3x3 conv's W window (+ zero pad, stride-2 or 2x NN W-upsample)
    into per-H-tap (w*c, wo*cout) = (64, 64) blocks.  Row index:
    tap*(cin*in_w) + ci*in_w + w_in; column index: co*wo + w_out (c-major)."""
    layer_order = (("enc1", 2, False, True), ("enc2", 2, False, True),
                   ("dec1", 1, True, True), ("dec2", 1, True, False))
    w_blocks, b_rows, cfgs = [], [], []
    w_cur = input_width
    for name, stride, upsample, relu in layer_order:
        w_oihw, bias = params[name]
        w = np.asarray(w_oihw, np.float32)                 # (cout, cin, 3, 3)
        bias = np.asarray(bias, np.float32)
        cout, cin, kh, kw = w.shape
        in_w = w_cur
        if upsample:
            wo = 2 * in_w
            sel = np.zeros((kw, in_w, wo), np.float32)
            for j in range(kw):
                for vo in range(wo):
                    vp = vo + j - 1                        # col in upsampled grid
                    if 0 <= vp < wo:                       # else: zero padding
                        sel[j, vp // 2, vo] += 1.0         # up[vp] = x[vp // 2]
        else:
            wo = (in_w + 2 - kw) // stride + 1
            sel = np.zeros((kw, in_w, wo), np.float32)
            for j in range(kw):
                for o in range(wo):
                    wi = stride * o + j - 1
                    if 0 <= wi < in_w:                     # else: zero padding
                        sel[j, wi, o] = 1.0
        # band[i, ci, w_in, co, wo] = sum_j sel[j, w_in, wo] * w[co, ci, i, j]
        band = np.einsum("jwv,ocij->icwov", sel, w)
        w_blocks.append(band.reshape(kh, cin * in_w, cout * wo))   # (3, 64, 64)
        b_rows.append(np.repeat(bias, wo))                 # (cout*wo,) c-major
        cfgs.append((stride, upsample, relu))
        w_cur = wo
    w_stack = jnp.asarray(np.stack(w_blocks), jnp.bfloat16)        # (4, 3, 64, 64)
    b_stack = jnp.asarray(np.stack(b_rows)[:, None, :], jnp.float32)  # (4, 1, 64)
    return w_stack, b_stack, tuple(cfgs)


# ----------------------------------------------------------------------------
# Forward pass (jitted per-step function) and parameter init.
# ----------------------------------------------------------------------------
def autoencoder_forward(w_stack, b_stack, x_nchw, *, cfgs):
    N, C, H, W = x_nchw.shape

    # Advisory cost estimate for XLA's scheduler.
    flops, h = 0, H
    for stride, upsample, _ in cfgs:
        if upsample:
            h *= 2
        ho = (h + 2 - 3) // stride + 1
        flops += 3 * 2 * (N * ho) * 64 * 64                # per-tap 64x64 GEMMs
        h = ho
    bytes_accessed = (x_nchw.size * x_nchw.dtype.itemsize
                      + w_stack.size * w_stack.dtype.itemsize
                      + b_stack.size * b_stack.dtype.itemsize
                      + N * H * C * W * 4)

    out_flat = pl.pallas_call(
        functools.partial(_ae_fused_kernel, cfgs=cfgs),
        out_shape=jax.ShapeDtypeStruct((N * H, C * W), jnp.float32),
        compiler_params=pltpu.CompilerParams(vmem_limit_bytes=8 * 1024 * 1024),
        cost_estimate=pl.CostEstimate(flops=int(flops), transcendentals=0,
                                      bytes_accessed=int(bytes_accessed)),
    )(x_nchw, w_stack, b_stack)

    # (N*H, C*W) c-major slab -> NCHW (tiny 8 KiB relayout outside the kernel).
    return jnp.transpose(out_flat.reshape(N, H, C, W), (0, 2, 1, 3))


def init_params(cin=4):
    def conv_init(key, cout, cin_, k=3):
        kw_, kb_ = jax.random.split(key)
        scale = 1.0 / jnp.sqrt(cin_ * k * k)
        w = jax.random.uniform(kw_, (cout, cin_, k, k), jnp.float32,
                               -scale, scale)
        b = jax.random.uniform(kb_, (cout,), jnp.float32, -scale, scale)
        return w, b

    keys = jax.random.split(jax.random.PRNGKey(42), 4)
    return {
        "enc1": conv_init(keys[0], 8, cin),
        "enc2": conv_init(keys[1], 16, 8),
        "dec1": conv_init(keys[2], 8, 16),
        "dec2": conv_init(keys[3], cin, 8),
    }


# ----------------------------------------------------------------------------
# Plain-JAX reference (same bf16 rounding points) for a numerical sanity check.
# ----------------------------------------------------------------------------
def _ref_conv(x_nhwc, w_oihw, b, stride, relu):
    w = jnp.transpose(w_oihw, (2, 3, 1, 0)).astype(jnp.bfloat16)
    w = w.astype(jnp.float32)
    y = jax.lax.conv_general_dilated(
        x_nhwc, w, window_strides=(stride, stride), padding=((1, 1), (1, 1)),
        dimension_numbers=("NHWC", "HWIO", "NHWC"))
    y = y + b.astype(jnp.float32)
    if relu:
        y = jnp.maximum(y, 0.0)
    return y


def reference_forward(params, x_nchw):
    x = jnp.transpose(x_nchw, (0, 2, 3, 1))
    x = x.astype(jnp.bfloat16).astype(jnp.float32)
    w, b = params["enc1"]; x = _ref_conv(x, w, b, 2, True)
    x = x.astype(jnp.bfloat16).astype(jnp.float32)
    w, b = params["enc2"]; x = _ref_conv(x, w, b, 2, True)
    x = x.astype(jnp.bfloat16).astype(jnp.float32)
    x = jnp.repeat(jnp.repeat(x, 2, axis=1), 2, axis=2)
    w, b = params["dec1"]; x = _ref_conv(x, w, b, 1, True)
    x = x.astype(jnp.bfloat16).astype(jnp.float32)
    x = jnp.repeat(jnp.repeat(x, 2, axis=1), 2, axis=2)
    w, b = params["dec2"]; x = _ref_conv(x, w, b, 1, False)
    return jnp.transpose(x, (0, 3, 1, 2))


if __name__ == "__main__":
    N, C, H, W = 2, 4, 16, 16
    x = jax.random.normal(jax.random.PRNGKey(0), (N, C, H, W), jnp.float32)
    params = init_params(cin=C)

    # Banded-weight folding runs ONCE, outside the per-step jit.
    w_stack, b_stack, cfgs = prepare_kernel_params(params, input_width=W)

    fwd = jax.jit(functools.partial(autoencoder_forward, cfgs=cfgs))
    out = fwd(w_stack, b_stack, x)
    jax.block_until_ready(out)

    assert out.shape == (N, C, H, W), out.shape
    assert out.dtype == jnp.float32
    assert bool(jnp.all(jnp.isfinite(out)))

    ref = jax.jit(reference_forward)(params, x)
    err = float(jnp.max(jnp.abs(out - ref)))
    assert err < 5e-2, f"mismatch vs reference: {err}"

    print("KERNEL_OK")
</pallas_src>

<mosaic_0001>
module attributes {stable_mosaic.version = 11 : i64} {
  func.func @_ae_fused_kernel(%arg0: memref<2x4x16x16xf32, #tpu.memory_space<vmem>>, %arg1: memref<4x3x64x64xbf16, #tpu.memory_space<vmem>>, %arg2: memref<4x1x64xf32, #tpu.memory_space<vmem>>, %arg3: memref<32x64xf32, #tpu.memory_space<vmem>>) attributes {dimension_semantics = [], scalar_prefetch = 0 : i64, scratch_operands = 0 : i64, tpu.core_type = #tpu.core_type<tc>} {
    %c0 = arith.constant 0 : index
    %c0_0 = arith.constant 0 : index
    %c0_1 = arith.constant 0 : index
    %c0_2 = arith.constant 0 : index
    %0 = vector.load %arg0[%c0, %c0_0, %c0_1, %c0_2] : memref<2x4x16x16xf32, #tpu.memory_space<vmem>>, vector<2x4x16x16xf32>
    %1 = vector.extract_strided_slice %0 {offsets = [0, 0, 0, 0], sizes = [2, 1, 16, 16], strides = [1, 1, 1, 1]} : vector<2x4x16x16xf32> to vector<2x1x16x16xf32>
    %2 = vector.shape_cast %1 : vector<2x1x16x16xf32> to vector<2x16x16xf32>
    %3 = vector.extract_strided_slice %0 {offsets = [0, 1, 0, 0], sizes = [2, 1, 16, 16], strides = [1, 1, 1, 1]} : vector<2x4x16x16xf32> to vector<2x1x16x16xf32>
    %4 = vector.shape_cast %3 : vector<2x1x16x16xf32> to vector<2x16x16xf32>
    %5 = vector.extract_strided_slice %0 {offsets = [0, 2, 0, 0], sizes = [2, 1, 16, 16], strides = [1, 1, 1, 1]} : vector<2x4x16x16xf32> to vector<2x1x16x16xf32>
    %6 = vector.shape_cast %5 : vector<2x1x16x16xf32> to vector<2x16x16xf32>
    %7 = vector.extract_strided_slice %0 {offsets = [0, 3, 0, 0], sizes = [2, 1, 16, 16], strides = [1, 1, 1, 1]} : vector<2x4x16x16xf32> to vector<2x1x16x16xf32>
    %8 = vector.shape_cast %7 : vector<2x1x16x16xf32> to vector<2x16x16xf32>
    %9 = tpu.concatenate %2, %4, %6, %8 in 2 : vector<2x16x16xf32>, vector<2x16x16xf32>, vector<2x16x16xf32>, vector<2x16x16xf32> -> vector<2x16x64xf32>
    %cst = arith.constant 0.000000e+00 : f32
    %10 = vector.broadcast %cst : f32 to vector<2x1x64xf32>
    %11 = tpu.concatenate %10, %9, %10 in 1 : vector<2x1x64xf32>, vector<2x16x64xf32>, vector<2x1x64xf32> -> vector<2x18x64xf32>
    %12 = vector.shape_cast %11 : vector<2x18x64xf32> to vector<2x9x2x64xf32>
    %13 = vector.extract_strided_slice %12 {offsets = [0, 0, 0, 0], sizes = [2, 9, 1, 64], strides = [1, 1, 1, 1]} : vector<2x9x2x64xf32> to vector<2x9x1x64xf32>
    %14 = vector.shape_cast %13 : vector<2x9x1x64xf32> to vector<2x9x64xf32>
    %15 = vector.extract_strided_slice %12 {offsets = [0, 0, 1, 0], sizes = [2, 9, 1, 64], strides = [1, 1, 1, 1]} : vector<2x9x2x64xf32> to vector<2x9x1x64xf32>
    %16 = vector.shape_cast %15 : vector<2x9x1x64xf32> to vector<2x9x64xf32>
    %17 = vector.extract_strided_slice %14 {offsets = [0, 0, 0], sizes = [2, 8, 64], strides = [1, 1, 1]} : vector<2x9x64xf32> to vector<2x8x64xf32>
    %18 = vector.extract_strided_slice %16 {offsets = [0, 0, 0], sizes = [2, 8, 64], strides = [1, 1, 1]} : vector<2x9x64xf32> to vector<2x8x64xf32>
    %19 = vector.extract_strided_slice %14 {offsets = [0, 1, 0], sizes = [2, 8, 64], strides = [1, 1, 1]} : vector<2x9x64xf32> to vector<2x8x64xf32>
    %c0_3 = arith.constant 0 : index
    %c0_4 = arith.constant 0 : index
    %c0_5 = arith.constant 0 : index
    %20 = vector.load %arg2[%c0_3, %c0_4, %c0_5] : memref<4x1x64xf32, #tpu.memory_space<vmem>>, vector<1x1x64xf32>
    %21 = vector.shape_cast %20 : vector<1x1x64xf32> to vector<1x64xf32>
    %22 = vector.shape_cast %17 : vector<2x8x64xf32> to vector<16x64xf32>
    %23 = arith.truncf %22 : vector<16x64xf32> to vector<16x64xbf16>
    %c0_6 = arith.constant 0 : index
    %c0_7 = arith.constant 0 : index
    %c0_8 = arith.constant 0 : index
    %c0_9 = arith.constant 0 : index
    %24 = vector.load %arg1[%c0_6, %c0_7, %c0_8, %c0_9] : memref<4x3x64x64xbf16, #tpu.memory_space<vmem>>, vector<1x1x64x64xbf16>
    %25 = vector.shape_cast %24 : vector<1x1x64x64xbf16> to vector<64x64xbf16>
    %cst_10 = arith.constant dense<0.000000e+00> : vector<16x64xf32>
    %26 = tpu.matmul %23, %25, %cst_10 {dimension_numbers = #tpu.dot_dimension_numbers<[1], [0], [0], [1], [0, 0, 1, 1], [], []>} : vector<16x64xbf16>, vector<64x64xbf16>, vector<16x64xf32> -> vector<16x64xf32>
    %27 = vector.broadcast %21 : vector<1x64xf32> to vector<16x64xf32>
    %28 = arith.addf %27, %26 : vector<16x64xf32>
    %29 = vector.shape_cast %18 : vector<2x8x64xf32> to vector<16x64xf32>
    %30 = arith.truncf %29 : vector<16x64xf32> to vector<16x64xbf16>
    %c0_11 = arith.constant 0 : index
    %c1 = arith.constant 1 : index
    %c0_12 = arith.constant 0 : index
    %c0_13 = arith.constant 0 : index
    %31 = vector.load %arg1[%c0_11, %c1, %c0_12, %c0_13] : memref<4x3x64x64xbf16, #tpu.memory_space<vmem>>, vector<1x1x64x64xbf16>
    %32 = vector.shape_cast %31 : vector<1x1x64x64xbf16> to vector<64x64xbf16>
    %cst_14 = arith.constant dense<0.000000e+00> : vector<16x64xf32>
    %33 = tpu.matmul %30, %32, %cst_14 {dimension_numbers = #tpu.dot_dimension_numbers<[1], [0], [0], [1], [0, 0, 1, 1], [], []>} : vector<16x64xbf16>, vector<64x64xbf16>, vector<16x64xf32> -> vector<16x64xf32>
    %34 = arith.addf %28, %33 : vector<16x64xf32>
    %35 = vector.shape_cast %19 : vector<2x8x64xf32> to vector<16x64xf32>
    %36 = arith.truncf %35 : vector<16x64xf32> to vector<16x64xbf16>
    %c0_15 = arith.constant 0 : index
    %c2 = arith.constant 2 : index
    %c0_16 = arith.constant 0 : index
    %c0_17 = arith.constant 0 : index
    %37 = vector.load %arg1[%c0_15, %c2, %c0_16, %c0_17] : memref<4x3x64x64xbf16, #tpu.memory_space<vmem>>, vector<1x1x64x64xbf16>
    %38 = vector.shape_cast %37 : vector<1x1x64x64xbf16> to vector<64x64xbf16>
    %cst_18 = arith.constant dense<0.000000e+00> : vector<16x64xf32>
    %39 = tpu.matmul %36, %38, %cst_18 {dimension_numbers = #tpu.dot_dimension_numbers<[1], [0], [0], [1], [0, 0, 1, 1], [], []>} : vector<16x64xbf16>, vector<64x64xbf16>, vector<16x64xf32> -> vector<16x64xf32>
    %40 = arith.addf %34, %39 : vector<16x64xf32>
    %cst_19 = arith.constant 0.000000e+00 : f32
    %41 = vector.broadcast %cst_19 : f32 to vector<16x64xf32>
    %42 = arith.maximumf %40, %41 : vector<16x64xf32>
    %43 = vector.shape_cast %42 : vector<16x64xf32> to vector<2x8x64xf32>
    %cst_20 = arith.constant 0.000000e+00 : f32
    %44 = vector.broadcast %cst_20 : f32 to vector<2x1x64xf32>
    %45 = tpu.concatenate %44, %43, %44 in 1 : vector<2x1x64xf32>, vector<2x8x64xf32>, vector<2x1x64xf32> -> vector<2x10x64xf32>
    %46 = vector.shape_cast %45 : vector<2x10x64xf32> to vector<2x5x2x64xf32>
    %47 = vector.extract_strided_slice %46 {offsets = [0, 0, 0, 0], sizes = [2, 5, 1, 64], strides = [1, 1, 1, 1]} : vector<2x5x2x64xf32> to vector<2x5x1x64xf32>
    %48 = vector.shape_cast %47 : vector<2x5x1x64xf32> to vector<2x5x64xf32>
    %49 = vector.extract_strided_slice %46 {offsets = [0, 0, 1, 0], sizes = [2, 5, 1, 64], strides = [1, 1, 1, 1]} : vector<2x5x2x64xf32> to vector<2x5x1x64xf32>
    %50 = vector.shape_cast %49 : vector<2x5x1x64xf32> to vector<2x5x64xf32>
    %51 = vector.extract_strided_slice %48 {offsets = [0, 0, 0], sizes = [2, 4, 64], strides = [1, 1, 1]} : vector<2x5x64xf32> to vector<2x4x64xf32>
    %52 = vector.extract_strided_slice %50 {offsets = [0, 0, 0], sizes = [2, 4, 64], strides = [1, 1, 1]} : vector<2x5x64xf32> to vector<2x4x64xf32>
    %53 = vector.extract_strided_slice %48 {offsets = [0, 1, 0], sizes = [2, 4, 64], strides = [1, 1, 1]} : vector<2x5x64xf32> to vector<2x4x64xf32>
    %c1_21 = arith.constant 1 : index
    %c0_22 = arith.constant 0 : index
    %c0_23 = arith.constant 0 : index
    %54 = vector.load %arg2[%c1_21, %c0_22, %c0_23] : memref<4x1x64xf32, #tpu.memory_space<vmem>>, vector<1x1x64xf32>
    %55 = vector.shape_cast %54 : vector<1x1x64xf32> to vector<1x64xf32>
    %56 = vector.shape_cast %51 : vector<2x4x64xf32> to vector<8x64xf32>
    %57 = arith.truncf %56 : vector<8x64xf32> to vector<8x64xbf16>
    %c1_24 = arith.constant 1 : index
    %c0_25 = arith.constant 0 : index
    %c0_26 = arith.constant 0 : index
    %c0_27 = arith.constant 0 : index
    %58 = vector.load %arg1[%c1_24, %c0_25, %c0_26, %c0_27] : memref<4x3x64x64xbf16, #tpu.memory_space<vmem>>, vector<1x1x64x64xbf16>
    %59 = vector.shape_cast %58 : vector<1x1x64x64xbf16> to vector<64x64xbf16>
    %cst_28 = arith.constant dense<0.000000e+00> : vector<8x64xf32>
    %60 = tpu.matmul %57, %59, %cst_28 {dimension_numbers = #tpu.dot_dimension_numbers<[1], [0], [0], [1], [0, 0, 1, 1], [], []>} : vector<8x64xbf16>, vector<64x64xbf16>, vector<8x64xf32> -> vector<8x64xf32>
    %61 = vector.broadcast %55 : vector<1x64xf32> to vector<8x64xf32>
    %62 = arith.addf %61, %60 : vector<8x64xf32>
    %63 = vector.shape_cast %52 : vector<2x4x64xf32> to vector<8x64xf32>
    %64 = arith.truncf %63 : vector<8x64xf32> to vector<8x64xbf16>
    %c1_29 = arith.constant 1 : index
    %c1_30 = arith.constant 1 : index
    %c0_31 = arith.constant 0 : index
    %c0_32 = arith.constant 0 : index
    %65 = vector.load %arg1[%c1_29, %c1_30, %c0_31, %c0_32] : memref<4x3x64x64xbf16, #tpu.memory_space<vmem>>, vector<1x1x64x64xbf16>
    %66 = vector.shape_cast %65 : vector<1x1x64x64xbf16> to vector<64x64xbf16>
    %cst_33 = arith.constant dense<0.000000e+00> : vector<8x64xf32>
    %67 = tpu.matmul %64, %66, %cst_33 {dimension_numbers = #tpu.dot_dimension_numbers<[1], [0], [0], [1], [0, 0, 1, 1], [], []>} : vector<8x64xbf16>, vector<64x64xbf16>, vector<8x64xf32> -> vector<8x64xf32>
    %68 = arith.addf %62, %67 : vector<8x64xf32>
    %69 = vector.shape_cast %53 : vector<2x4x64xf32> to vector<8x64xf32>
    %70 = arith.truncf %69 : vector<8x64xf32> to vector<8x64xbf16>
    %c1_34 = arith.constant 1 : index
    %c2_35 = arith.constant 2 : index
    %c0_36 = arith.constant 0 : index
    %c0_37 = arith.constant 0 : index
    %71 = vector.load %arg1[%c1_34, %c2_35, %c0_36, %c0_37] : memref<4x3x64x64xbf16, #tpu.memory_space<vmem>>, vector<1x1x64x64xbf16>
    %72 = vector.shape_cast %71 : vector<1x1x64x64xbf16> to vector<64x64xbf16>
    %cst_38 = arith.constant dense<0.000000e+00> : vector<8x64xf32>
    %73 = tpu.matmul %70, %72, %cst_38 {dimension_numbers = #tpu.dot_dimension_numbers<[1], [0], [0], [1], [0, 0, 1, 1], [], []>} : vector<8x64xbf16>, vector<64x64xbf16>, vector<8x64xf32> -> vector<8x64xf32>
    %74 = arith.addf %68, %73 : vector<8x64xf32>
    %cst_39 = arith.constant 0.000000e+00 : f32
    %75 = vector.broadcast %cst_39 : f32 to vector<8x64xf32>
    %76 = arith.maximumf %74, %75 : vector<8x64xf32>
    %77 = vector.shape_cast %76 : vector<8x64xf32> to vector<2x4x64xf32>
    %78 = vector.shape_cast %77 : vector<2x4x64xf32> to vector<2x4x1x64xf32>
    %79 = vector.shape_cast %77 : vector<2x4x64xf32> to vector<2x4x1x64xf32>
    %80 = tpu.concatenate %78, %79 in 2 : vector<2x4x1x64xf32>, vector<2x4x1x64xf32> -> vector<2x4x2x64xf32>
    %81 = vector.shape_cast %80 : vector<2x4x2x64xf32> to vector<2x8x64xf32>
    %cst_40 = arith.constant 0.000000e+00 : f32
    %82 = vector.broadcast %cst_40 : f32 to vector<2x1x64xf32>
    %83 = tpu.concatenate %82, %81, %82 in 1 : vector<2x1x64xf32>, vector<2x8x64xf32>, vector<2x1x64xf32> -> vector<2x10x64xf32>
    %84 = vector.extract_strided_slice %83 {offsets = [0, 0, 0], sizes = [2, 8, 64], strides = [1, 1, 1]} : vector<2x10x64xf32> to vector<2x8x64xf32>
    %85 = vector.extract_strided_slice %83 {offsets = [0, 1, 0], sizes = [2, 8, 64], strides = [1, 1, 1]} : vector<2x10x64xf32> to vector<2x8x64xf32>
    %86 = vector.extract_strided_slice %83 {offsets = [0, 2, 0], sizes = [2, 8, 64], strides = [1, 1, 1]} : vector<2x10x64xf32> to vector<2x8x64xf32>
    %c2_41 = arith.constant 2 : index
    %c0_42 = arith.constant 0 : index
    %c0_43 = arith.constant 0 : index
    %87 = vector.load %arg2[%c2_41, %c0_42, %c0_43] : memref<4x1x64xf32, #tpu.memory_space<vmem>>, vector<1x1x64xf32>
    %88 = vector.shape_cast %87 : vector<1x1x64xf32> to vector<1x64xf32>
    %89 = vector.shape_cast %84 : vector<2x8x64xf32> to vector<16x64xf32>
    %90 = arith.truncf %89 : vector<16x64xf32> to vector<16x64xbf16>
    %c2_44 = arith.constant 2 : index
    %c0_45 = arith.constant 0 : index
    %c0_46 = arith.constant 0 : index
    %c0_47 = arith.constant 0 : index
    %91 = vector.load %arg1[%c2_44, %c0_45, %c0_46, %c0_47] : memref<4x3x64x64xbf16, #tpu.memory_space<vmem>>, vector<1x1x64x64xbf16>
    %92 = vector.shape_cast %91 : vector<1x1x64x64xbf16> to vector<64x64xbf16>
    %cst_48 = arith.constant dense<0.000000e+00> : vector<16x64xf32>
    %93 = tpu.matmul %90, %92, %cst_48 {dimension_numbers = #tpu.dot_dimension_numbers<[1], [0], [0], [1], [0, 0, 1, 1], [], []>} : vector<16x64xbf16>, vector<64x64xbf16>, vector<16x64xf32> -> vector<16x64xf32>
    %94 = vector.broadcast %88 : vector<1x64xf32> to vector<16x64xf32>
    %95 = arith.addf %94, %93 : vector<16x64xf32>
    %96 = vector.shape_cast %85 : vector<2x8x64xf32> to vector<16x64xf32>
    %97 = arith.truncf %96 : vector<16x64xf32> to vector<16x64xbf16>
    %c2_49 = arith.constant 2 : index
    %c1_50 = arith.constant 1 : index
    %c0_51 = arith.constant 0 : index
    %c0_52 = arith.constant 0 : index
    %98 = vector.load %arg1[%c2_49, %c1_50, %c0_51, %c0_52] : memref<4x3x64x64xbf16, #tpu.memory_space<vmem>>, vector<1x1x64x64xbf16>
    %99 = vector.shape_cast %98 : vector<1x1x64x64xbf16> to vector<64x64xbf16>
    %cst_53 = arith.constant dense<0.000000e+00> : vector<16x64xf32>
    %100 = tpu.matmul %97, %99, %cst_53 {dimension_numbers = #tpu.dot_dimension_numbers<[1], [0], [0], [1], [0, 0, 1, 1], [], []>} : vector<16x64xbf16>, vector<64x64xbf16>, vector<16x64xf32> -> vector<16x64xf32>
    %101 = arith.addf %95, %100 : vector<16x64xf32>
    %102 = vector.shape_cast %86 : vector<2x8x64xf32> to vector<16x64xf32>
    %103 = arith.truncf %102 : vector<16x64xf32> to vector<16x64xbf16>
    %c2_54 = arith.constant 2 : index
    %c2_55 = arith.constant 2 : index
    %c0_56 = arith.constant 0 : index
    %c0_57 = arith.constant 0 : index
    %104 = vector.load %arg1[%c2_54, %c2_55, %c0_56, %c0_57] : memref<4x3x64x64xbf16, #tpu.memory_space<vmem>>, vector<1x1x64x64xbf16>
    %105 = vector.shape_cast %104 : vector<1x1x64x64xbf16> to vector<64x64xbf16>
    %cst_58 = arith.constant dense<0.000000e+00> : vector<16x64xf32>
    %106 = tpu.matmul %103, %105, %cst_58 {dimension_numbers = #tpu.dot_dimension_numbers<[1], [0], [0], [1], [0, 0, 1, 1], [], []>} : vector<16x64xbf16>, vector<64x64xbf16>, vector<16x64xf32> -> vector<16x64xf32>
    %107 = arith.addf %101, %106 : vector<16x64xf32>
    %cst_59 = arith.constant 0.000000e+00 : f32
    %108 = vector.broadcast %cst_59 : f32 to vector<16x64xf32>
    %109 = arith.maximumf %107, %108 : vector<16x64xf32>
    %110 = vector.shape_cast %109 : vector<16x64xf32> to vector<2x8x64xf32>
    %111 = vector.shape_cast %110 : vector<2x8x64xf32> to vector<2x8x1x64xf32>
    %112 = vector.shape_cast %110 : vector<2x8x64xf32> to vector<2x8x1x64xf32>
    %113 = tpu.concatenate %111, %112 in 2 : vector<2x8x1x64xf32>, vector<2x8x1x64xf32> -> vector<2x8x2x64xf32>
    %114 = vector.shape_cast %113 : vector<2x8x2x64xf32> to vector<2x16x64xf32>
    %cst_60 = arith.constant 0.000000e+00 : f32
    %115 = vector.broadcast %cst_60 : f32 to vector<2x1x64xf32>
    %116 = tpu.concatenate %115, %114, %115 in 1 : vector<2x1x64xf32>, vector<2x16x64xf32>, vector<2x1x64xf32> -> vector<2x18x64xf32>
    %117 = vector.extract_strided_slice %116 {offsets = [0, 0, 0], sizes = [2, 16, 64], strides = [1, 1, 1]} : vector<2x18x64xf32> to vector<2x16x64xf32>
    %118 = vector.extract_strided_slice %116 {offsets = [0, 1, 0], sizes = [2, 16, 64], strides = [1, 1, 1]} : vector<2x18x64xf32> to vector<2x16x64xf32>
    %119 = vector.extract_strided_slice %116 {offsets = [0, 2, 0], sizes = [2, 16, 64], strides = [1, 1, 1]} : vector<2x18x64xf32> to vector<2x16x64xf32>
    %c3 = arith.constant 3 : index
    %c0_61 = arith.constant 0 : index
    %c0_62 = arith.constant 0 : index
    %120 = vector.load %arg2[%c3, %c0_61, %c0_62] : memref<4x1x64xf32, #tpu.memory_space<vmem>>, vector<1x1x64xf32>
    %121 = vector.shape_cast %120 : vector<1x1x64xf32> to vector<1x64xf32>
    %122 = vector.shape_cast %117 : vector<2x16x64xf32> to vector<32x64xf32>
    %123 = arith.truncf %122 : vector<32x64xf32> to vector<32x64xbf16>
    %c3_63 = arith.constant 3 : index
    %c0_64 = arith.constant 0 : index
    %c0_65 = arith.constant 0 : index
    %c0_66 = arith.constant 0 : index
    %124 = vector.load %arg1[%c3_63, %c0_64, %c0_65, %c0_66] : memref<4x3x64x64xbf16, #tpu.memory_space<vmem>>, vector<1x1x64x64xbf16>
    %125 = vector.shape_cast %124 : vector<1x1x64x64xbf16> to vector<64x64xbf16>
    %cst_67 = arith.constant dense<0.000000e+00> : vector<32x64xf32>
    %126 = tpu.matmul %123, %125, %cst_67 {dimension_numbers = #tpu.dot_dimension_numbers<[1], [0], [0], [1], [0, 0, 1, 1], [], []>} : vector<32x64xbf16>, vector<64x64xbf16>, vector<32x64xf32> -> vector<32x64xf32>
    %127 = vector.broadcast %121 : vector<1x64xf32> to vector<32x64xf32>
    %128 = arith.addf %127, %126 : vector<32x64xf32>
    %129 = vector.shape_cast %118 : vector<2x16x64xf32> to vector<32x64xf32>
    %130 = arith.truncf %129 : vector<32x64xf32> to vector<32x64xbf16>
    %c3_68 = arith.constant 3 : index
    %c1_69 = arith.constant 1 : index
    %c0_70 = arith.constant 0 : index
    %c0_71 = arith.constant 0 : index
    %131 = vector.load %arg1[%c3_68, %c1_69, %c0_70, %c0_71] : memref<4x3x64x64xbf16, #tpu.memory_space<vmem>>, vector<1x1x64x64xbf16>
    %132 = vector.shape_cast %131 : vector<1x1x64x64xbf16> to vector<64x64xbf16>
    %cst_72 = arith.constant dense<0.000000e+00> : vector<32x64xf32>
    %133 = tpu.matmul %130, %132, %cst_72 {dimension_numbers = #tpu.dot_dimension_numbers<[1], [0], [0], [1], [0, 0, 1, 1], [], []>} : vector<32x64xbf16>, vector<64x64xbf16>, vector<32x64xf32> -> vector<32x64xf32>
    %134 = arith.addf %128, %133 : vector<32x64xf32>
    %135 = vector.shape_cast %119 : vector<2x16x64xf32> to vector<32x64xf32>
    %136 = arith.truncf %135 : vector<32x64xf32> to vector<32x64xbf16>
    %c3_73 = arith.constant 3 : index
    %c2_74 = arith.constant 2 : index
    %c0_75 = arith.constant 0 : index
    %c0_76 = arith.constant 0 : index
    %137 = vector.load %arg1[%c3_73, %c2_74, %c0_75, %c0_76] : memref<4x3x64x64xbf16, #tpu.memory_space<vmem>>, vector<1x1x64x64xbf16>
    %138 = vector.shape_cast %137 : vector<1x1x64x64xbf16> to vector<64x64xbf16>
    %cst_77 = arith.constant dense<0.000000e+00> : vector<32x64xf32>
    %139 = tpu.matmul %136, %138, %cst_77 {dimension_numbers = #tpu.dot_dimension_numbers<[1], [0], [0], [1], [0, 0, 1, 1], [], []>} : vector<32x64xbf16>, vector<64x64xbf16>, vector<32x64xf32> -> vector<32x64xf32>
    %140 = arith.addf %134, %139 : vector<32x64xf32>
    %c0_78 = arith.constant 0 : index
    %c0_79 = arith.constant 0 : index
    %141 = vector.load %arg3[%c0_78, %c0_79] : memref<32x64xf32, #tpu.memory_space<vmem>>, vector<32x64xf32>
    tpu.vector_store %arg3[%c0_78, %c0_79], %140 {strides = array<i32>} : memref<32x64xf32, #tpu.memory_space<vmem>>, vector<32x64xf32>,
    return
  }
}

</mosaic_0001>

<bundles_post_ra>
// kernel: autoencoder_forward.1
= control target key start
LH: loop header
LB: loop body
LE: loop exit
PB: predicated region body
PF: predicated region fallthrough
CT: control target
= control target key end

     0   :  { %8 = vsyncpa [#allocation3], 0  ;;  %s2990_s0 = inlined_call_operand.hbm [shape: f32[2,4,16,16], index: 0, kind: input, shape index: {}]   ;;  %s2991_s1 = inlined_call_operand.hbm [shape: bf16[4,3,64,64], index: 1, kind: input, shape index: {}]   ;;  %s2992_s2 = inlined_call_operand.hbm [shape: f32[4,1,64], index: 2, kind: input, shape index: {}]   ;;  %s2993_s3 = inlined_call_operand.vmem [shape: f32[32,64], index: 3, kind: output, shape index: {}]  }
   0x1   :  { %9 = vsyncpa [#allocation5], 0  ;;  %s2542_s12 = smov [#allocation4]   ;;  %s2472_s16 = scalar_lea.hbm %s2991_s1, 6144 }
   0x2   :  { %s27_s13 = sshll.u32 %s2542_s12, 4  ;;  %p2473_p0 = scmp.ne.s32.totalorder %s2991_s1, %s2472_s16  ;;  %s28_s13 = int_to_ptr.vmem [resolvable:$true] %s27_s13 }
   0x3   :  { %p2476_p1 = scmp.lt.u32.totalorder %s2472_s16, %s2991_s1 }
   0x5   :  { %p2478_p2 = pnand %p2476_p1, %p2473_p0 }
   0x7   :  { %2481 = shalt.err (!%p2478_p2)
}
   0x8   :  { %s2482_s21 = scalar_lea.vmem %s28_s13, 6144  ;;  %p2487_p4 = scmp.lt.s32.totalorder %s28_s13, %s28_s13 }
   0x9   :  { %p2483_p3 = scmp.ne.s32.totalorder %s28_s13, %s2482_s21  ;;  %p2488_p5 = scmp.lt.s32.totalorder %s2482_s21, %s2482_s21 }
   0xb   :  { %p2489_p6 = por %p2488_p5, %p2487_p4 }
   0xd   :  { %p2490_p7 = pnand %p2489_p6, %p2483_p3 }
   0xf   :  { %2493 = shalt.err (!%p2490_p7)
}
  0x10   :  { %s2543_s22 = smov 64   ;;  %s2544_s23 = smov 4  }
  0x11   :  { %33 = dma.hbm_to_vmem [thread:$0]  %s2991_s1, 6144, %s28_s13, [#allocation5], %s2543_s22, %s2543_s22, %s2544_s23  }
  0x12   :  { %s2545_s26 = smov [#allocation2]   ;;  %s2494_s30 = scalar_lea.hbm %s2990_s0, 2048 }
  0x13   :  { %s15_s27 = sshll.u32 %s2545_s26, 4  ;;  %p2495_p8 = scmp.ne.s32.totalorder %s2990_s0, %s2494_s30  ;;  %s16_s27 = int_to_ptr.vmem [resolvable:$true] %s15_s27 }
  0x14   :  { %p2498_p9 = scmp.lt.u32.totalorder %s2494_s30, %s2990_s0 }
  0x16   :  { %p2500_p10 = pnand %p2498_p9, %p2495_p8 }
  0x18   :  { %2503 = shalt.err (!%p2500_p10)
}
  0x19   :  { %s2504_s8 = scalar_lea.vmem %s16_s27, 2048  ;;  %p2509_p12 = scmp.lt.s32.totalorder %s16_s27, %s16_s27 }
  0x1a   :  { %p2505_p11 = scmp.ne.s32.totalorder %s16_s27, %s2504_s8  ;;  %p2510_p13 = scmp.lt.s32.totalorder %s2504_s8, %s2504_s8 }
  0x1c   :  { %p2511_p0 = por %p2510_p13, %p2509_p12 }
  0x1e   :  { %p2512_p1 = pnand %p2511_p0, %p2505_p11 }
  0x20   :  { %2515 = shalt.err (!%p2512_p1)
}
  0x21   :  { %s2546_s1 = smov 128   ;;  %s2547_s9 = smov 8  }
  0x22   :  { %21 = dma.hbm_to_vmem [thread:$0]  %s2990_s0, 2048, %s16_s27, [#allocation3], %s2546_s1, %s2546_s1, %s2547_s9  }
  0x23   :  { %s2548_s12 = smov [#allocation6]   ;;  %s2516_s16 = scalar_lea.hbm %s2992_s2, 64 }
  0x24   :  { %s39_s13 = sshll.u32 %s2548_s12, 4  ;;  %p2517_p2 = scmp.ne.s32.totalorder %s2992_s2, %s2516_s16  ;;  %s40_s13 = int_to_ptr.vmem [resolvable:$true] %s39_s13 }
  0x25   :  { %p2520_p3 = scmp.lt.u32.totalorder %s2516_s16, %s2992_s2 }
  0x27   :  { %p2522_p4 = pnand %p2520_p3, %p2517_p2 }
  0x29   :  { %2525 = shalt.err (!%p2522_p4)
}
  0x2a   :  { %s2526_s21 = scalar_lea.vmem %s40_s13, 64  ;;  %p2531_p6 = scmp.lt.s32.totalorder %s40_s13, %s40_s13 }
  0x2b   :  { %p2527_p5 = scmp.ne.s32.totalorder %s40_s13, %s2526_s21  ;;  %p2532_p7 = scmp.lt.s32.totalorder %s2526_s21, %s2526_s21 }
  0x2d   :  { %p2533_p8 = por %p2532_p7, %p2531_p6 }
  0x2f   :  { %p2534_p9 = pnand %p2533_p8, %p2527_p5 }
  0x31   :  { %2537 = shalt.err (!%p2534_p9)
}
  0x32   :  { %s2549_s0 = smov 16   ;;  %s2550_s22 = smov 1  }
  0x33   :  { %45 = dma.hbm_to_vmem [thread:$0]  %s2992_s2, 64, %s40_s13, [#allocation5], %s2549_s0, %s2549_s0, %s2550_s22  }
  0x34   :  { %2538 = dma.done.wait [#allocation3], 2048  }
  0x35   :  { %2539 = vsyncadd [#allocation3], 4294965248 }
  0x36   :  { %2540 = dma.done.wait [#allocation5], 6208  }
  0x37   :  { %2541 = vsyncadd [#allocation5], 4294961088  ;;  %v60_v0 = vld [vmem:[#allocation2 + $0x20] sm:$0xff]  ;;  %v58_v1 = vld [vmem:[#allocation2 + $0x10] sm:$0xff]  ;;  %s2551_s25 = smov 32   ;;  %s2552_s26 = smov 48   ;;  %v162_v23 = vlaneseq }
  0x38   :  { %92 = vrot.lane.b32.xlu1 %v60_v0, %s2551_s25  ;;  %76 = vrot.lane.b32.xlu0 %v58_v1, %s2549_s0  ;;  %v68_v2 = vld [vmem:[#allocation2 + $0x60] sm:$0xff]  ;;  %v66_v3 = vld [vmem:[#allocation2 + $0x50] sm:$0xff]  ;;  %v67_v6 = vld [vmem:[#allocation2 + $0x58] sm:$0xff]  ;;  %v2553_v13 = vmov 0.0   ;;  %vm2554_vm0 = vmmov 0   ;;  %vm120_vm1 = vcmask 130048  }
  0x39   :  { %v70_v4 = vld [vmem:[#allocation2 + $0x70] sm:$0xff]  ;;  %v59_v7 = vld [vmem:[#allocation2 + $0x18] sm:$0xff]  ;;  %v69_v8 = vld [vmem:[#allocation2 + $0x68] sm:$0xff]  ;;  %2224 = vmatprep.subr.bf16.mxu0 %v2553_v13  ;;  %2260 = vmatprep.subr.bf16.mxu1 %v2553_v13  ;;  %v2555_v21 = vmov 1983009808   ;;  %vm125_vm2 = vcmask 261120  }
  0x3a   :  { %v62_v5 = vld [vmem:[#allocation2 + $0x30] sm:$0xff]  ;;  %v61_v9 = vld [vmem:[#allocation2 + $0x28] sm:$0xff]  ;;  %v71_v10 = vld [vmem:[#allocation2 + $0x78] sm:$0xff]  ;;  %2232 = vmatprep.mubr.msk.bf16.mxu0 %vm2554_vm0, %v2553_v13  ;;  %2268 = vmatprep.mubr.msk.bf16.mxu1 %vm2554_vm0, %v2553_v13  ;;  %v160_v22 = vunpack.c.l.s4 %v2555_v21  ;;  %vm130_vm3 = vcmask 392192   ;;  %v2625_v29 = vshrl.u32 %v162_v23, 7  ;;  %vm139_vm4 = vcmask 1040384  }
  0x3b   :  { %v63_v11 = vld [vmem:[#allocation2 + $0x38] sm:$0xff]  ;;  %v2424_v12 = vld [vmem:[#allocation4] sm:$0xff]   ;;  %v2425_v14 = vld [vmem:[#allocation4 + $0x8] sm:$0xff]   ;;  %vm316_vm5 = vcmask 1041409   ;;  %vm319_vm6 = vcmask 1042434   ;;  %vm322_vm7 = vcmask 1043459  }
  0x3c   :  { %96 = vrot.lane.b32.xlu1 %v68_v2, %s2551_s25  ;;  %80 = vrot.lane.b32.xlu0 %v66_v3, %s2549_s0  ;;  %v2426_v15 = vld [vmem:[#allocation4 + $0x10] sm:$0xff]   ;;  %v2427_v16 = vld [vmem:[#allocation4 + $0x18] sm:$0xff]   ;;  %v56_v19 = vld [vmem:[#allocation2] sm:$0xff]  ;;  %v161_v28 = vunpack.c.0.s8 %v160_v22  ;;  %vm325_vm8 = vcmask 1044484   ;;  %vm328_vm9 = vcmask 1045509   ;;  %vm331_vm10 = vcmask 1046534  }
  0x3d   :  { %2225 = vmatpush3.bf16.msra.mxu0 %v2424_v12  ;;  %v64_v20 = vld [vmem:[#allocation2 + $0x40] sm:$0xff]  ;;  %v65_v53 = vld [vmem:[#allocation2 + $0x48] sm:$0xff]  ;;  %vm334_vm11 = vcmask 1047559   ;;  %vm375_vm12 = vcmask 523264   ;;  %vm1270_vm13 = vcmask 1046528   ;;  %vm1359_vm14 = vcmask 1045504  }
  0x3e   :  { %2226 = vmatprep.subr.bf16.mxu0 %v2553_v13  ;;  %v2632_v36 = vsub.s32 %v161_v28, %v2625_v29  ;;  %v57_v55 = vld [vmem:[#allocation2 + $0x8] sm:$0xff] }
  0x40   :  { %112 = vrot.lane.b32.xlu1 %v70_v4, %s2552_s26  ;;  %108 = vrot.lane.b32.xlu0 %v62_v5, %s2552_s26 }
  0x41   :  { %2227 = vmatpush3.bf16.msra.mxu0 %v2425_v14 }
  0x42   :  { %2228 = vmatprep.subr.bf16.mxu0 %v2553_v13 }
  0x44   :  { %82 = vrot.lane.b32.xlu1 %v67_v6, %s2549_s0  ;;  %78 = vrot.lane.b32.xlu0 %v59_v7, %s2549_s0 }
  0x45   :  { %2229 = vmatpush3.bf16.msra.mxu0 %v2426_v15 }
  0x46   :  { %2230 = vmatprep.subr.bf16.mxu0 %v2553_v13 }
  0x48   :  { %98 = vrot.lane.b32.xlu1 %v69_v8, %s2551_s25  ;;  %94 = vrot.lane.b32.xlu0 %v61_v9, %s2551_s25 }
  0x49   :  { %2231 = vmatpush3.bf16.msra.mxu0 %v2427_v16 }
  0x4a   :  { %2236 = vmatprep.subr.bf16.mxu0 %v2553_v13 }
  0x4c   :  { %114 = vrot.lane.b32.xlu1 %v71_v10, %s2552_s26  ;;  %110 = vrot.lane.b32.xlu0 %v63_v11, %s2552_s26 }
  0xaa   :  { %v93_v17 = vpop.permute.xlu1 %92  ;;  %v77_v18 = vpop.permute.xlu0 %76 }
  0xab   :  { %v121_v26 = vsel %vm120_vm1, %v56_v19, %v77_v18 }
  0xac   :  { %v126_v33 = vsel %vm125_vm2, %v121_v26, %v93_v17 }
  0xae   :  { %v97_v24 = vpop.permute.xlu1 %96  ;;  %v81_v25 = vpop.permute.xlu0 %80 }
  0xaf   :  { %v123_v27 = vsel %vm120_vm1, %v64_v20, %v81_v25 }
  0xb0   :  { %v128_v31 = vsel %vm125_vm2, %v123_v27, %v97_v24 }
  0xb2   :  { %v113_v30 = vpop.permute.xlu1 %112  ;;  %v109_v32 = vpop.permute.xlu0 %108 }
  0xb3   :  { %v133_v34 = vsel %vm130_vm3, %v128_v31, %v113_v30  ;;  %v131_v35 = vsel %vm130_vm3, %v126_v33, %v109_v32 }
  0xb4   :  { %v143_v37 = vrot.slane %v133_v34, 7  ;;  %v140_v38 = vrot.slane %v131_v35, 7 }
  0xb6   :  { %v151_v39 = vsel %vm139_vm4, 0.0, %v143_v37  ;;  %v83_v40 = vpop.permute.xlu1 %82  ;;  %v150_v42 = vsel %vm139_vm4, 0.0, %v140_v38  ;;  %v79_v43 = vpop.permute.xlu0 %78 }
  0xb7   :  { %v206_v41 = vrot.slane %v151_v39, %v2632_v36  ;;  %v199_v44 = vcombine.high %v151_v39, %v151_v39  ;;  %v165_v45 = vrot.slane %v150_v42, %v2632_v36  ;;  %v158_v48 = vcombine.high %v150_v42, %v150_v42 }
  0xb8   :  { %v124_v60 = vsel %vm120_vm1, %v65_v53, %v83_v40  ;;  %v122_v62 = vsel %vm120_vm1, %v57_v55, %v79_v43 }
  0xb9   :  { %v214_v46 = vcombine.high %v206_v41, %v206_v41  ;;  %v213_v49 = vrot.slane %v199_v44, %v2632_v36  ;;  %v173_v51 = vcombine.high %v165_v45, %v165_v45  ;;  %v172_v54 = vrot.slane %v158_v48, %v2632_v36 }
  0xba   :  { %v99_v47 = vpop.permute.xlu1 %98  ;;  %v95_v50 = vpop.permute.xlu0 %94  ;;  %v267_v1 = vpack.c.bf16 %v206_v41, %v206_v41  ;;  %v259_v12 = vpack.c.bf16 %v165_v45, %v165_v45 }
  0xbb   :  { %v268_v52 = vpack.c.bf16 %v214_v46, %v214_v46  ;;  %v215_v56 = vcombine.high %v213_v49, %v213_v49  ;;  %v269_v57 = vpack.c.bf16 %v213_v49, %v213_v49  ;;  %v260_v59 = vpack.c.bf16 %v173_v51, %v173_v51 }
  0xbc   :  { %v129_v63 = vsel %vm125_vm2, %v124_v60, %v99_v47  ;;  %v174_v2 = vcombine.high %v172_v54, %v172_v54  ;;  %v261_v3 = vpack.c.bf16 %v172_v54, %v172_v54  ;;  %v127_v7 = vsel %vm125_vm2, %v122_v62, %v95_v50 }
  0xbd   :  { %v2641_v61 = vunpack.c.l.b16 %v268_v52  ;;  %v270_v5 = vpack.c.bf16 %v215_v56, %v215_v56  ;;  %v2648_v6 = vunpack.c.l.b16 %v269_v57  ;;  %v2652_v9 = vunpack.c.l.b16 %v260_v59 }
  0xbe   :  { %v115_v58 = vpop.permute.xlu1 %114  ;;  %v111_v0 = vpop.permute.xlu0 %110  ;;  %v2662_v16 = vunpack.c.l.b16 %v267_v1  ;;  %v262_v17 = vpack.c.bf16 %v174_v2, %v174_v2  ;;  %v2668_v22 = vunpack.c.l.b16 %v261_v3  ;;  %v299_v32 = vunpack.c.l.b16 %v259_v12 }
  0xbf   :  { %v2646_v4 = vsel %vm130_vm3, %v129_v63, %v115_v58  ;;  %v2655_v10 = vsel %vm130_vm3, %v127_v7, %v111_v0  ;;  %v336_v11 = vrot.slane %v2641_v61, 7  ;;  %v2665_v20 = vunpack.c.l.b16 %v270_v5 }
  0xc0   :  { %v144_v8 = vrot.slane %v2646_v4, 7  ;;  %v141_v15 = vrot.slane %v2655_v10, 7  ;;  %v338_v21 = vrot.slane %v2648_v6, 6  ;;  %v315_v24 = vrot.slane %v2652_v9, 7  ;;  %v2432_v10 = vld [vmem:[#allocation4 + $0x40] sm:$0xff]  }
  0xc1   :  { %v337_v28 = vsel %vm316_vm5, %v336_v11, %v2662_v16  ;;  %v2678_v33 = vunpack.c.l.b16 %v262_v17  ;;  %v318_v43 = vrot.slane %v2668_v22, 6  ;;  %v451_v62 = vrot.slane %v2662_v16, 1 }
  0xc2   :  { %v145_v14 = vsel %vm139_vm4, %v143_v37, %v144_v8  ;;  %v142_v23 = vsel %vm139_vm4, %v140_v38, %v141_v15  ;;  %v340_v37 = vrot.slane %v2665_v20, 5  ;;  %v339_v41 = vsel %vm319_vm6, %v338_v21, %v337_v28 }
  0xc3   :  { %v216_v18 = vcombine.high %v145_v14, %v145_v14  ;;  %v223_v19 = vrot.slane %v145_v14, %v2632_v36  ;;  %v175_v30 = vcombine.high %v142_v23, %v142_v23  ;;  %v182_v31 = vrot.slane %v142_v23, %v2632_v36 }
  0xc4   :  { %v317_v42 = vsel %vm316_vm5, %v315_v24, %v299_v32  ;;  %v341_v50 = vsel %vm322_vm7, %v340_v37, %v339_v41  ;;  %v321_v54 = vrot.slane %v2678_v33, 5  ;;  %v437_v11 = vrot.slane %v299_v32, 1  ;;  %v2428_v32 = vld [vmem:[#allocation4 + $0x20] sm:$0xff]  }
  0xc5   :  { %v230_v25 = vrot.slane %v216_v18, %v2632_v36  ;;  %v231_v26 = vcombine.high %v223_v19, %v223_v19  ;;  %v271_v27 = vpack.c.bf16 %v223_v19, %v223_v19  ;;  %v189_v39 = vrot.slane %v175_v30, %v2632_v36 }
  0xc6   :  { %v190_v40 = vcombine.high %v182_v31, %v182_v31  ;;  %v263_v47 = vpack.c.bf16 %v182_v31, %v182_v31  ;;  %v320_v53 = vsel %vm319_vm6, %v318_v43, %v317_v42  ;;  %v453_v18 = vrot.slane %v2648_v6, 7  ;;  %v2429_v42 = vld [vmem:[#allocation4 + $0x28] sm:$0xff]  }
  0xc7   :  { %v272_v34 = vpack.c.bf16 %v231_v26, %v231_v26  ;;  %v2680_v35 = vunpack.c.l.b16 %v271_v27  ;;  %v273_v38 = vpack.c.bf16 %v230_v25, %v230_v25  ;;  %v232_v44 = vcombine.high %v230_v25, %v230_v25 }
  0xc8   :  { %v191_v46 = vcombine.high %v189_v39, %v189_v39  ;;  %v264_v48 = vpack.c.bf16 %v190_v40, %v190_v40  ;;  %v265_v52 = vpack.c.bf16 %v189_v39, %v189_v39  ;;  %v2696_v58 = vunpack.c.l.b16 %v263_v47 }
  0xc9   :  { %v2687_v45 = vunpack.c.l.b16 %v272_v34  ;;  %v342_v49 = vrot.slane %v2680_v35, 4  ;;  %v2691_v51 = vunpack.c.l.b16 %v273_v38  ;;  %v274_v55 = vpack.c.bf16 %v232_v44, %v232_v44 }
  0xca   :  { %v266_v56 = vpack.c.bf16 %v191_v46, %v191_v46  ;;  %v2698_v59 = vunpack.c.l.b16 %v264_v48  ;;  %v2700_v60 = vunpack.c.l.b16 %v265_v52  ;;  %v324_v2 = vrot.slane %v2696_v58, 4  ;;  %v2430_v48 = vld [vmem:[#allocation4 + $0x30] sm:$0xff]  }
  0xcb   :  { %v344_v57 = vrot.slane %v2687_v45, 3  ;;  %v343_v0 = vsel %vm325_vm8, %v342_v49, %v341_v50  ;;  %v346_v1 = vrot.slane %v2691_v51, 2  ;;  %v323_v7 = vsel %vm322_vm7, %v321_v54, %v320_v53 }
  0xcc   :  { %v2703_v63 = vunpack.c.l.b16 %v266_v56  ;;  %v327_v3 = vrot.slane %v2698_v59, 3  ;;  %v330_v5 = vrot.slane %v2700_v60, 2  ;;  %v2711_v12 = vunpack.c.l.b16 %v274_v55 }
  0xcd   :  { %v326_v14 = vsel %vm325_vm8, %v324_v2, %v323_v7  ;;  %v345_v17 = vsel %vm328_vm9, %v344_v57, %v343_v0  ;;  %v452_v21 = vsel %vm316_vm5, %v2641_v61, %v451_v62  ;;  %v439_v23 = vrot.slane %v2668_v22, 7 }
  0xce   :  { %v333_v16 = vrot.slane %v2703_v63, 1  ;;  %v329_v19 = vsel %vm328_vm9, %v327_v3, %v326_v14  ;;  %v347_v25 = vsel %vm331_vm10, %v346_v1, %v345_v17  ;;  %v438_v26 = vsel %vm316_vm5, %v2652_v9, %v437_v11  ;;  %v2433_v1 = vld [vmem:[#allocation4 + $0x48] sm:$0xff]   ;;  %v2434_v14 = vld [vmem:[#allocation4 + $0x50] sm:$0xff]  }
  0xcf   :  { %v332_v24 = vsel %vm331_vm10, %v330_v5, %v329_v19  ;;  %v348_v28 = vrot.slane %v2711_v12, 1  ;;  %v454_v6 = vsel %vm319_vm6, %v453_v18, %v452_v21  ;;  %v455_v30 = vrot.slane %v2665_v20, 6  ;;  %v2435_v21 = vld [vmem:[#allocation4 + $0x58] sm:$0xff]  }
  0xd0   :  { %v335_v27 = vsel %vm334_vm11, %v333_v16, %v332_v24  ;;  %v441_v31 = vrot.slane %v2678_v33, 6  ;;  %v440_v34 = vsel %vm319_vm6, %v439_v23, %v438_v26  ;;  %v457_v37 = vrot.slane %v2680_v35, 5  ;;  %v2436_v26 = vld [vmem:[#allocation4 + $0x60] sm:$0xff]  }
  0xd1   :  { %v349_v22 = vsel %vm334_vm11, %v348_v28, %v347_v25  ;;  %v443_v38 = vrot.slane %v2696_v58, 5  ;;  %v456_v40 = vsel %vm322_vm7, %v455_v30, %v454_v6  ;;  %v459_v20 = vrot.slane %v2687_v45, 4  ;;  %2261 = vmatpush3.bf16.msra.mxu1 %v2436_v26  ;;  %v2438_v28 = vld [vmem:[#allocation4 + $0x70] sm:$0xff]   ;;  %v2439_v6 = vld [vmem:[#allocation4 + $0x78] sm:$0xff]  }
  0xd2   :  { %v350_v39 = vpack.c.b16 %v349_v22, %v335_v27  ;;  %v442_v41 = vsel %vm322_vm7, %v441_v31, %v440_v34  ;;  %v445_v33 = vrot.slane %v2698_v59, 4  ;;  %v458_v35 = vsel %vm325_vm8, %v457_v37, %v456_v40  ;;  %2262 = vmatprep.subr.bf16.mxu1 %v2553_v13  ;;  %v2437_v27 = vld [vmem:[#allocation4 + $0x68] sm:$0xff]  }
  0xd3   :  { %v444_v43 = vsel %vm325_vm8, %v443_v38, %v442_v41  ;;  %v461_v44 = vrot.slane %v2691_v51, 3  ;;  %v447_v46 = vrot.slane %v2700_v60, 3  ;;  %v460_v47 = vsel %vm328_vm9, %v459_v20, %v458_v35  ;;  %v2431_v51 = vld [vmem:[#allocation4 + $0x38] sm:$0xff]  }
  0xd4   :  { %2233 = vmatmul.mubr.msk.bf16.vlgmr.msra.gmra.mrb[0].mxu0 %vm375_vm12, %v350_v39  ;;  %v446_v45 = vsel %vm328_vm9, %v445_v33, %v444_v43  ;;  %v463_v49 = vrot.slane %v2711_v12, 2  ;;  %v449_v50 = vrot.slane %v2703_v63, 2  ;;  %v153_v54 = vsel %vm139_vm4, %v144_v8, 0.0 }
  0xd5   :  { %2237 = vmatpush3.bf16.msra.mxu0 %v2428_v32  ;;  %2244 = vmatprep.mubr.msk.bf16.mxu0 %vm2554_vm0, %v2553_v13  ;;  %v448_v52 = vsel %vm331_vm10, %v447_v46, %v446_v45  ;;  %v462_v53 = vsel %vm331_vm10, %v461_v44, %v460_v47  ;;  %v152_v55 = vsel %vm139_vm4, %v141_v15, 0.0  ;;  %v559_v56 = vsel %vm316_vm5, %v453_v18, %v2641_v61 }
  0xd6   :  { %2238 = vmatprep.subr.bf16.mxu0 %v2553_v13  ;;  %v551_v57 = vsel %vm316_vm5, %v439_v23, %v2652_v9  ;;  %v450_v58 = vsel %vm334_vm11, %v449_v50, %v448_v52  ;;  %v464_v59 = vsel %vm334_vm11, %v463_v49, %v462_v53  ;;  %v239_v4 = vrot.slane %v153_v54, %v2632_v36 }
  0xd7   :  { %v198_v8 = vrot.slane %v152_v55, %v2632_v36  ;;  %v560_v15 = vsel %vm319_vm6, %v455_v30, %v559_v56  ;;  %v552_v60 = vsel %vm319_vm6, %v441_v31, %v551_v57  ;;  %v465_v62 = vpack.c.b16 %v464_v59, %v450_v58  ;;  %2263 = vmatpush3.bf16.msra.mxu1 %v2437_v27  ;;  %v2099_v30 = vld [vmem:[#allocation6] ss:$0 sm:$0xff] }
  0xd8   :  { %v561_v61 = vsel %vm322_vm7, %v457_v37, %v560_v15  ;;  %v553_v9 = vsel %vm322_vm7, %v443_v38, %v552_v60  ;;  %v537_v63 = vpack.c.bf16 %v239_v4, %v239_v4  ;;  %2264 = vmatprep.subr.bf16.mxu1 %v2553_v13 }
  0xd9   :  { %2239 = vmatpush3.bf16.msra.mxu0 %v2429_v42  ;;  %v536_v0 = vpack.c.bf16 %v198_v8, %v198_v8  ;;  %v562_v2 = vsel %vm325_vm8, %v459_v20, %v561_v61  ;;  %v554_v3 = vsel %vm325_vm8, %v445_v33, %v553_v9 }
  0xda   :  { %2240 = vmatprep.subr.bf16.mxu0 %v2553_v13  ;;  %v550_v5 = vunpack.c.l.b16 %v537_v63  ;;  %v563_v7 = vsel %vm328_vm9, %v461_v44, %v562_v2  ;;  %v555_v12 = vsel %vm328_vm9, %v447_v46, %v554_v3 }
  0xdb   :  { %v549_v11 = vunpack.c.l.b16 %v536_v0  ;;  %v564_v16 = vsel %vm331_vm10, %v463_v49, %v563_v7  ;;  %v556_v17 = vsel %vm331_vm10, %v449_v50, %v555_v12  ;;  %2265 = vmatpush3.bf16.msra.mxu1 %v2438_v28 }
  0xdc   :  { %v565_v18 = vrot.slane %v550_v5, 1  ;;  %2266 = vmatprep.subr.bf16.mxu1 %v2553_v13 }
  0xdd   :  { %2241 = vmatpush3.bf16.msra.mxu0 %v2430_v48  ;;  %v557_v19 = vrot.slane %v549_v11, 1 }
  0xde   :  { %2242 = vmatprep.subr.bf16.mxu0 %v2553_v13  ;;  %v566_v23 = vsel %vm334_vm11, %v565_v18, %v564_v16 }
  0xdf   :  { %v558_v24 = vsel %vm334_vm11, %v557_v19, %v556_v17  ;;  %2267 = vmatpush3.bf16.msra.mxu1 %v2439_v6 }
  0xe0   :  { %v567_v25 = vpack.c.b16 %v566_v23, %v558_v24  ;;  %2272 = vmatprep.subr.bf16.mxu1 %v2553_v13 }
  0xe1   :  { %2243 = vmatpush3.bf16.msra.mxu0 %v2431_v51 }
  0xe2   :  { %2248 = vmatprep.subr.bf16.mxu0 %v2553_v13 }
  0xe4   :  { %2245 = vmatmul.mubr.msk.bf16.vlgmr.msra.gmra.mrb[0].mxu0 %vm375_vm12, %v465_v62 }
  0xe5   :  { %2249 = vmatpush3.bf16.msra.mxu0 %v2432_v10  ;;  %2256 = vmatprep.mubr.msk.bf16.mxu0 %vm2554_vm0, %v2553_v13 }
  0xe6   :  { %2250 = vmatprep.subr.bf16.mxu0 %v2553_v13 }
  0xe9   :  { %2251 = vmatpush3.bf16.msra.mxu0 %v2433_v1 }
  0xea   :  { %2252 = vmatprep.subr.bf16.mxu0 %v2553_v13 }
  0xed   :  { %2253 = vmatpush3.bf16.msra.mxu0 %v2434_v14 }
  0xee   :  { %2254 = vmatprep.subr.bf16.mxu0 %v2553_v13 }
  0xf1   :  { %2255 = vmatpush3.bf16.msra.mxu0 %v2435_v21 }
  0xf2   :  { %2296 = vmatprep.subr.bf16.mxu0 %v2553_v13 }
  0xf4   :  { %2257 = vmatmul.mubr.msk.bf16.vlgmr.msra.gmra.mrb[0].mxu0 %vm375_vm12, %v567_v25 }
  0xf5   :  { %2304 = vmatprep.mubr.msk.bf16.mxu0 %vm2554_vm0, %v2553_v13 }
 0x1c7   :  { %v629_v31 = vpop.f32.mrb[0].mxu0 }
 0x1c8   :  { %v2368_v22 = vadd.f32 %v2099_v30, %v629_v31  ;;  %v2258_v32 = vpop.f32.mrb[1].mxu0 }
 0x1c9   :  { %v632_v34 = vpop.f32.mrb[2].mxu0 }
 0x1ca   :  { %v638_v37 = vmax.f32 %v2368_v22, 0.0  ;;  %v2369_v38 = vadd.f32 %v2099_v30, %v632_v34  ;;  %v2259_v39 = vpop.f32.mrb[3].mxu0 }
 0x1cc   :  { %v642_v40 = vrot.slane %v638_v37, 7  ;;  %v639_v41 = vmax.f32 %v2369_v38, 0.0 }
 0x1ce   :  { %v646_v20 = vsel %vm139_vm4, 0.0, %v642_v40  ;;  %v648_v33 = vsel %vm139_vm4, %v642_v40, 0.0  ;;  %v643_v42 = vrot.slane %v639_v41, 7 }
 0x1cf   :  { %v654_v35 = vcombine.high %v646_v20, %v646_v20  ;;  %v661_v43 = vrot.slane %v646_v20, %v2632_v36  ;;  %v677_v44 = vrot.slane %v648_v33, %v2632_v36 }
 0x1d0   :  { %v647_v46 = vsel %vm139_vm4, 0.0, %v643_v42  ;;  %v649_v47 = vsel %vm139_vm4, %v643_v42, 0.0 }
 0x1d1   :  { %v668_v45 = vrot.slane %v654_v35, %v2632_v36  ;;  %v669_v48 = vcombine.high %v661_v43, %v661_v43  ;;  %v714_v49 = vpack.c.bf16 %v661_v43, %v661_v43  ;;  %v928_v50 = vpack.c.bf16 %v677_v44, %v677_v44 }
 0x1d2   :  { %v678_v52 = vcombine.high %v647_v46, %v647_v46  ;;  %v685_v53 = vrot.slane %v647_v46, %v2632_v36  ;;  %v701_v51 = vrot.slane %v649_v47, %v2632_v36 }
 0x1d3   :  { %v670_v54 = vcombine.high %v668_v45, %v668_v45  ;;  %v715_v55 = vpack.c.bf16 %v669_v48, %v669_v48  ;;  %v716_v56 = vpack.c.bf16 %v668_v45, %v668_v45  ;;  %v739_v57 = vunpack.c.l.b16 %v714_v49  ;;  %v2440_v45 = vld [vmem:[#allocation4 + $0x80] sm:$0xff]  }
 0x1d4   :  { %v941_v58 = vunpack.c.l.b16 %v928_v50  ;;  %v692_v59 = vrot.slane %v678_v52, %v2632_v36  ;;  %v693_v4 = vcombine.high %v685_v53, %v685_v53  ;;  %v718_v8 = vpack.c.bf16 %v685_v53, %v685_v53 }
 0x1d5   :  { %v717_v10 = vpack.c.bf16 %v670_v54, %v670_v54  ;;  %v740_v15 = vunpack.c.l.b16 %v715_v55  ;;  %v741_v60 = vunpack.c.l.b16 %v716_v56  ;;  %v845_v62 = vrot.slane %v739_v57, 1  ;;  %v2441_v54 = vld [vmem:[#allocation4 + $0x88] sm:$0xff]   ;;  %v2442_v55 = vld [vmem:[#allocation4 + $0x90] sm:$0xff]   ;;  %v2443_v56 = vld [vmem:[#allocation4 + $0x98] sm:$0xff]  }
 0x1d6   :  { %v945_v61 = vrot.slane %v941_v58, 5  ;;  %v694_v9 = vcombine.high %v692_v59, %v692_v59  ;;  %v719_v63 = vpack.c.bf16 %v693_v4, %v693_v4  ;;  %v720_v0 = vpack.c.bf16 %v692_v59, %v692_v59  ;;  %v2445_v59 = vld [vmem:[#allocation4 + $0xa8] sm:$0xff]   ;;  %v2446_v4 = vld [vmem:[#allocation4 + $0xb0] sm:$0xff]  }
 0x1d7   :  { %v742_v1 = vunpack.c.l.b16 %v717_v10  ;;  %v747_v2 = vrot.slane %v740_v15, 7  ;;  %v749_v3 = vrot.slane %v741_v60, 6  ;;  %v846_v5 = vsel %vm316_vm5, %v740_v15, %v845_v62  ;;  %v2450_v62 = vld [vmem:[#allocation4 + $0xd0] sm:$0xff]  }
 0x1d8   :  { %v847_v7 = vrot.slane %v741_v60, 7  ;;  %v721_v11 = vpack.c.bf16 %v694_v9, %v694_v9  ;;  %v743_v12 = vunpack.c.l.b16 %v718_v8  ;;  %v744_v14 = vunpack.c.l.b16 %v719_v63  ;;  %v2447_v8 = vld [vmem:[#allocation4 + $0xb8] sm:$0xff]   ;;  %v2449_v60 = vld [vmem:[#allocation4 + $0xc8] sm:$0xff]  }
 0x1d9   :  { %v748_v16 = vsel %vm316_vm5, %v747_v2, %v739_v57  ;;  %v751_v17 = vrot.slane %v742_v1, 5  ;;  %v849_v18 = vrot.slane %v742_v1, 6  ;;  %v745_v19 = vunpack.c.l.b16 %v720_v0  ;;  %v2444_v57 = vld [vmem:[#allocation4 + $0xa0] sm:$0xff]  }
 0x1da   :  { %v750_v21 = vsel %vm319_vm6, %v749_v3, %v748_v16  ;;  %v848_v23 = vsel %vm319_vm6, %v847_v7, %v846_v5  ;;  %v943_v24 = vsel %vm316_vm5, %v847_v7, %v740_v15  ;;  %v746_v25 = vunpack.c.l.b16 %v721_v11  ;;  %v2448_v15 = vld [vmem:[#allocation4 + $0xc0] sm:$0xff]  }
 0x1db   :  { %v944_v26 = vsel %vm319_vm6, %v849_v18, %v943_v24  ;;  %v752_v27 = vsel %vm322_vm7, %v751_v17, %v750_v21  ;;  %v753_v28 = vrot.slane %v743_v12, 4  ;;  %v755_v30 = vrot.slane %v744_v14, 3  ;;  %2297 = vmatpush3.bf16.msra.mxu0 %v2448_v15  ;;  %v2115_v1 = vld [vmem:[#allocation6 + $0x1] ss:$0 sm:$0xff] }
 0x1dc   :  { %v946_v6 = vsel %vm322_vm7, %v945_v61, %v944_v26  ;;  %v850_v31 = vsel %vm322_vm7, %v849_v18, %v848_v23  ;;  %v757_v32 = vrot.slane %v745_v19, 2  ;;  %v851_v34 = vrot.slane %v743_v12, 5  ;;  %2298 = vmatprep.subr.bf16.mxu0 %v2553_v13  ;;  %v2451_v61 = vld [vmem:[#allocation4 + $0xd8] sm:$0xff]  }
 0x1dd   :  { %v754_v22 = vsel %vm325_vm8, %v753_v28, %v752_v27  ;;  %v853_v37 = vrot.slane %v744_v14, 4  ;;  %v759_v38 = vrot.slane %v746_v25, 1  ;;  %v855_v39 = vrot.slane %v745_v19, 3 }
 0x1de   :  { %v929_v40 = vpack.c.bf16 %v701_v51, %v701_v51  ;;  %v756_v41 = vsel %vm328_vm9, %v755_v30, %v754_v22  ;;  %v852_v20 = vsel %vm325_vm8, %v851_v34, %v850_v31  ;;  %v857_v33 = vrot.slane %v746_v25, 2 }
 0x1df   :  { %v947_v42 = vsel %vm325_vm8, %v853_v37, %v946_v6  ;;  %v758_v35 = vsel %vm331_vm10, %v757_v32, %v756_v41  ;;  %v854_v43 = vsel %vm328_vm9, %v853_v37, %v852_v20  ;;  %2299 = vmatpush3.bf16.msra.mxu0 %v2449_v60  ;;  %v2556_v9 = vmov 1966171168   ;;  %v2454_v60 = vld [vmem:[#allocation4 + $0xf0] sm:$0xff]  }
 0x1e0   :  { %v942_v44 = vunpack.c.l.b16 %v929_v40  ;;  %v948_v46 = vsel %vm328_vm9, %v855_v39, %v947_v42  ;;  %v760_v47 = vsel %vm334_vm11, %v759_v38, %v758_v35  ;;  %v856_v50 = vsel %vm331_vm10, %v855_v39, %v854_v43  ;;  %2300 = vmatprep.subr.bf16.mxu0 %v2553_v13 }
 0x1e1   :  { %v949_v48 = vsel %vm331_vm10, %v857_v33, %v948_v46  ;;  %v761_v49 = vpack.c.b16 %v760_v47, %v760_v47  ;;  %v858_v53 = vsel %vm334_vm11, %v857_v33, %v856_v50  ;;  %v1025_v63 = vunpack.c.l.s4 %v2556_v9 }
 0x1e2   :  { %v950_v52 = vrot.slane %v942_v44, 1  ;;  %v859_v58 = vpack.c.b16 %v858_v53, %v858_v53  ;;  %v2849_v18 = vsub.s32 0, %v2625_v29 }
 0x1e3   :  { %2269 = vmatmul.mubr.msk.bf16.vlgmr.msra.gmra.mrb[0].mxu1 %vm375_vm12, %v761_v49  ;;  %2301 = vmatpush3.bf16.msra.mxu0 %v2450_v62  ;;  %v1026_v0 = vunpack.c.0.s8 %v1025_v63 }
 0x1e4   :  { %v951_v51 = vsel %vm334_vm11, %v950_v52, %v949_v48  ;;  %2273 = vmatpush3.bf16.msra.mxu1 %v2440_v45  ;;  %2280 = vmatprep.mubr.msk.bf16.mxu1 %vm2554_vm0, %v2553_v13 }
 0x1e5   :  { %2274 = vmatprep.subr.bf16.mxu1 %v2553_v13  ;;  %v952_v10 = vpack.c.b16 %v951_v51, %v951_v51  ;;  %2302 = vmatprep.subr.bf16.mxu0 %v2553_v13  ;;  %v2845_v5 = vsub.s32 %v1026_v0, %v2625_v29  ;;  %v2455_v0 = vld [vmem:[#allocation4 + $0xf8] sm:$0xff]  }
 0x1e7   :  { %2303 = vmatpush3.bf16.msra.mxu0 %v2451_v61 }
 0x1e8   :  { %2275 = vmatpush3.bf16.msra.mxu1 %v2441_v54  ;;  %2308 = vmatprep.subr.bf16.mxu0 %v2553_v13 }
 0x1e9   :  { %2276 = vmatprep.subr.bf16.mxu1 %v2553_v13 }
 0x1ec   :  { %2277 = vmatpush3.bf16.msra.mxu1 %v2442_v55 }
 0x1ed   :  { %2278 = vmatprep.subr.bf16.mxu1 %v2553_v13 }
 0x1f0   :  { %2279 = vmatpush3.bf16.msra.mxu1 %v2443_v56 }
 0x1f1   :  { %2284 = vmatprep.subr.bf16.mxu1 %v2553_v13 }
 0x1f3   :  { %2281 = vmatmul.mubr.msk.bf16.vlgmr.msra.gmra.mrb[0].mxu1 %vm375_vm12, %v859_v58 }
 0x1f4   :  { %2285 = vmatpush3.bf16.msra.mxu1 %v2444_v57  ;;  %2292 = vmatprep.mubr.msk.bf16.mxu1 %vm2554_vm0, %v2553_v13 }
 0x1f5   :  { %2286 = vmatprep.subr.bf16.mxu1 %v2553_v13 }
 0x1f8   :  { %2287 = vmatpush3.bf16.msra.mxu1 %v2445_v59 }
 0x1f9   :  { %2288 = vmatprep.subr.bf16.mxu1 %v2553_v13 }
 0x1fc   :  { %2289 = vmatpush3.bf16.msra.mxu1 %v2446_v4  ;;  %v2452_v4 = vld [vmem:[#allocation4 + $0xe0] sm:$0xff]  }
 0x1fd   :  { %2290 = vmatprep.subr.bf16.mxu1 %v2553_v13 }
 0x200   :  { %2291 = vmatpush3.bf16.msra.mxu1 %v2447_v8 }
 0x203   :  { %2293 = vmatmul.mubr.msk.bf16.vlgmr.msra.gmra.mrb[0].mxu1 %vm375_vm12, %v952_v10  ;;  %v2453_v10 = vld [vmem:[#allocation4 + $0xe8] sm:$0xff]  }
 0x2d6   :  { %v1014_v2 = vpop.f32.mrb[0].mxu1 }
 0x2d7   :  { %v2370_v3 = vadd.f32 %v2115_v1, %v1014_v2  ;;  %v2294_v7 = vpop.f32.mrb[1].mxu1 }
 0x2d8   :  { %v1017_v11 = vpop.f32.mrb[2].mxu1  ;;  %v2456_v7 = vld [vmem:[#allocation4 + $0x100] sm:$0xff]  }
 0x2d9   :  { %v1021_v12 = vmax.f32 %v2370_v3, 0.0  ;;  %v2295_v14 = vpop.f32.mrb[3].mxu1 }
 0x2da   :  { %v2458_v14 = vld [vmem:[#allocation4 + $0x110] sm:$0xff]  }
 0x2db   :  { %v1023_v16 = vcombine.high %v1021_v12, %v1021_v12  ;;  %v1030_v17 = vrot.slane %v1021_v12, %v2845_v5  ;;  %v2457_v12 = vld [vmem:[#allocation4 + $0x108] sm:$0xff]  }
 0x2dd   :  { %v1037_v19 = vrot.slane %v1023_v16, %v2845_v5  ;;  %v1038_v21 = vcombine.high %v1030_v17, %v1030_v17  ;;  %v1046_v23 = vrot.slane %v1030_v17, %v2845_v5 }
 0x2df   :  { %v1039_v24 = vcombine.high %v1037_v19, %v1037_v19  ;;  %v1053_v25 = vrot.slane %v1037_v19, %v2845_v5  ;;  %v1060_v26 = vrot.slane %v1038_v21, %v2845_v5  ;;  %v1068_v27 = vcombine.high %v1046_v23, %v1046_v23  ;;  %v2459_v21 = vld [vmem:[#allocation4 + $0x118] sm:$0xff]  }
 0x2e0   :  { %v1083_v28 = vrot.slane %v1046_v23, %v2849_v18 }
 0x2e1   :  { %v1067_v6 = vrot.slane %v1039_v24, %v2845_v5  ;;  %v1069_v30 = vcombine.high %v1053_v25, %v1053_v25  ;;  %v1070_v31 = vcombine.high %v1060_v26, %v1060_v26  ;;  %v1087_v29 = vrot.slane %v1060_v26, %v2849_v18 }
 0x2e2   :  { %v1091_v22 = vrot.slane %v1068_v27, %v2849_v18  ;;  %v1099_v32 = vrot.slane %v1053_v25, %v2849_v18  ;;  %v1120_v40 = vsel %vm139_vm4, %v1046_v23, %v1083_v28  ;;  %v2461_v28 = vld [vmem:[#allocation4 + $0x128] sm:$0xff]  }
 0x2e3   :  { %v1071_v34 = vcombine.high %v1067_v6, %v1067_v6  ;;  %v1095_v37 = vrot.slane %v1070_v31, %v2849_v18  ;;  %v1103_v38 = vrot.slane %v1067_v6, %v2849_v18  ;;  %v1107_v39 = vrot.slane %v1069_v30, %v2849_v18 }
 0x2e4   :  { %v1121_v41 = vsel %vm139_vm4, %v1060_v26, %v1087_v29  ;;  %v1122_v20 = vsel %vm139_vm4, %v1068_v27, %v1091_v22  ;;  %v1124_v35 = vsel %vm139_vm4, %v1053_v25, %v1099_v32  ;;  %v2460_v27 = vld [vmem:[#allocation4 + $0x120] sm:$0xff]  }
 0x2e5   :  { %v1111_v33 = vrot.slane %v1071_v34, %v2849_v18  ;;  %v1123_v42 = vsel %vm139_vm4, %v1070_v31, %v1095_v37  ;;  %v1125_v43 = vsel %vm139_vm4, %v1067_v6, %v1103_v38  ;;  %v1136_v44 = vcombine.low %v1120_v40, %v1121_v41  ;;  %2332 = vmatprep.subr.bf16.mxu1 %v2460_v27  ;;  %v2462_v6 = vld [vmem:[#allocation4 + $0x130] sm:$0xff]   ;;  %v2131_v31 = vld [vmem:[#allocation6 + $0x2] ss:$0 sm:$0xff] }
 0x2e6   :  { %v1137_v46 = vcombine.low %v1122_v20, %v1123_v42  ;;  %v1153_v47 = vcombine.low %v1124_v35, %v1125_v43  ;;  %v1126_v45 = vsel %vm139_vm4, %v1069_v30, %v1107_v39  ;;  %2333 = vmatpush3.bf16.msra.mxu1 %v2460_v27  ;;  %v2463_v30 = vld [vmem:[#allocation4 + $0x138] sm:$0xff]  }
 0x2e7   :  { %v1127_v48 = vsel %vm139_vm4, %v1071_v34, %v1111_v33  ;;  %v1144_v49 = vrot.slane %v1136_v44, %v2632_v36  ;;  %2334 = vmatprep.subr.bf16.mxu1 %v2461_v28 }
 0x2e8   :  { %v1151_v50 = vrot.slane %v1137_v46, %v2632_v36  ;;  %v1154_v52 = vcombine.low %v1126_v45, %v1127_v48  ;;  %v1161_v51 = vrot.slane %v1153_v47, %v2632_v36 }
 0x2ea   :  { %v1152_v53 = vcombine.low %v1144_v49, %v1151_v50  ;;  %v1168_v54 = vrot.slane %v1154_v52, %v2632_v36  ;;  %2335 = vmatpush3.bf16.msra.mxu1 %v2461_v28 }
 0x2eb   :  { %2336 = vmatprep.subr.bf16.mxu1 %v2462_v6 }
 0x2ec   :  { %v1169_v55 = vcombine.low %v1161_v51, %v1168_v54  ;;  %v1170_v56 = vrot.slane %v1152_v53, 7 }
 0x2ee   :  { %v1171_v57 = vrot.slane %v1169_v55, 7  ;;  %v1174_v58 = vsel %vm139_vm4, 0.0, %v1170_v56  ;;  %v1176_v62 = vsel %vm139_vm4, %v1170_v56, 0.0  ;;  %2337 = vmatpush3.bf16.msra.mxu1 %v2462_v6 }
 0x2ef   :  { %v1271_v63 = vrot.slane %v1174_v58, 1  ;;  %v1272_v1 = vrot.slane %v1176_v62, 1  ;;  %v1360_v19 = vrot.slane %v1174_v58, 2  ;;  %v1361_v23 = vrot.slane %v1176_v62, 2  ;;  %2338 = vmatprep.subr.bf16.mxu1 %v2463_v30 }
 0x2f0   :  { %v1175_v59 = vsel %vm139_vm4, 0.0, %v1171_v57  ;;  %v1177_v15 = vsel %vm139_vm4, %v1171_v57, 0.0 }
 0x2f1   :  { %v1180_v8 = vpack.c.bf16 %v1175_v59, %v1174_v58  ;;  %v1274_v61 = vrot.slane %v1175_v59, 1  ;;  %v1275_v9 = vrot.slane %v1177_v15, 1  ;;  %v1273_v3 = vsel %vm1270_vm13, %v1271_v63, %v1272_v1 }
 0x2f2   :  { %v1363_v16 = vrot.slane %v1175_v59, 2  ;;  %v1364_v17 = vrot.slane %v1177_v15, 2  ;;  %v1362_v25 = vsel %vm1359_vm14, %v1360_v19, %v1361_v23  ;;  %2339 = vmatpush3.bf16.msra.mxu1 %v2463_v30 }
 0x2f3   :  { %2305 = vmatmul.mubr.msk.bf16.vlgmr.msra.gmra.mrb[4].mxu0 %vm375_vm12, %v1180_v8  ;;  %v1276_v2 = vsel %vm1270_vm13, %v1274_v61, %v1275_v9 }
 0x2f4   :  { %2309 = vmatpush3.bf16.msra.mxu0 %v2452_v4  ;;  %2316 = vmatprep.mubr.msk.bf16.mxu0 %vm2554_vm0, %v2553_v13  ;;  %v1279_v11 = vpack.c.bf16 %v1276_v2, %v1273_v3  ;;  %v1365_v24 = vsel %vm1359_vm14, %v1363_v16, %v1364_v17 }
 0x2f5   :  { %2310 = vmatprep.subr.bf16.mxu0 %v2553_v13  ;;  %v1368_v26 = vpack.c.bf16 %v1365_v24, %v1362_v25 }
 0x2f8   :  { %2311 = vmatpush3.bf16.msra.mxu0 %v2453_v10 }
 0x2f9   :  { %2312 = vmatprep.subr.bf16.mxu0 %v2553_v13 }
 0x2fc   :  { %2313 = vmatpush3.bf16.msra.mxu0 %v2454_v60 }
 0x2fd   :  { %2314 = vmatprep.subr.bf16.mxu0 %v2553_v13 }
 0x300   :  { %2315 = vmatpush3.bf16.msra.mxu0 %v2455_v0 }
 0x301   :  { %2320 = vmatprep.subr.bf16.mxu0 %v2553_v13 }
 0x303   :  { %2317 = vmatmul.mubr.msk.bf16.vlgmr.msra.gmra.mrb[4].mxu0 %vm375_vm12, %v1279_v11 }
 0x304   :  { %2321 = vmatpush3.bf16.msra.mxu0 %v2456_v7  ;;  %2328 = vmatprep.mubr.msk.bf16.mxu0 %vm2554_vm0, %v2553_v13 }
 0x305   :  { %2322 = vmatprep.subr.bf16.mxu0 %v2553_v13 }
 0x308   :  { %2323 = vmatpush3.bf16.msra.mxu0 %v2457_v12 }
 0x309   :  { %2324 = vmatprep.subr.bf16.mxu0 %v2553_v13 }
 0x30c   :  { %2325 = vmatpush3.bf16.msra.mxu0 %v2458_v14 }
 0x30d   :  { %2326 = vmatprep.subr.bf16.mxu0 %v2553_v13  ;;  %v2898_v13 = vld [vmem:[#allocation4 + $0x140] sm:$0xff]  }
 0x30e   :  { %2344 = vmatprep.subr.bf16.mxu1 %v2898_v13 }
 0x310   :  { %2327 = vmatpush3.bf16.msra.mxu0 %v2459_v21 }
 0x313   :  { %2329 = vmatmul.mubr.msk.bf16.vlgmr.msra.gmra.mrb[4].mxu0 %vm375_vm12, %v1368_v26 }
 0x3e6   :  { %v1439_v29 = vpop.f32.mrb[4].mxu0 }
 0x3e7   :  { %v2371_v22 = vadd.f32 %v2131_v31, %v1439_v29  ;;  %v2330_v32 = vpop.f32.mrb[5].mxu0 }
 0x3e8   :  { %v1442_v34 = vpop.f32.mrb[6].mxu0 }
 0x3e9   :  { %v1448_v37 = vmax.f32 %v2371_v22, 0.0  ;;  %v2372_v38 = vadd.f32 %v2131_v31, %v1442_v34  ;;  %v2331_v39 = vpop.f32.mrb[7].mxu0 }
 0x3eb   :  { %v1452_v40 = vcombine.high %v1448_v37, %v1448_v37  ;;  %v1459_v41 = vrot.slane %v1448_v37, %v2845_v5  ;;  %v1449_v20 = vmax.f32 %v2372_v38, 0.0 }
 0x3ed   :  { %v1466_v33 = vrot.slane %v1452_v40, %v2845_v5  ;;  %v1467_v42 = vcombine.high %v1459_v41, %v1459_v41  ;;  %v1475_v35 = vrot.slane %v1459_v41, %v2845_v5  ;;  %v1501_v43 = vcombine.high %v1449_v20, %v1449_v20 }
 0x3ee   :  { %v1508_v44 = vrot.slane %v1449_v20, %v2845_v5 }
 0x3ef   :  { %v1468_v46 = vcombine.high %v1466_v33, %v1466_v33  ;;  %v1482_v47 = vrot.slane %v1466_v33, %v2845_v5  ;;  %v1489_v45 = vrot.slane %v1467_v42, %v2845_v5  ;;  %v1497_v48 = vcombine.high %v1475_v35, %v1475_v35 }
 0x3f0   :  { %v1569_v49 = vrot.slane %v1475_v35, %v2849_v18  ;;  %v1515_v50 = vrot.slane %v1501_v43, %v2845_v5  ;;  %v1516_v52 = vcombine.high %v1508_v44, %v1508_v44  ;;  %v1524_v59 = vrot.slane %v1508_v44, %v2845_v5 }
 0x3f1   :  { %v1496_v53 = vrot.slane %v1468_v46, %v2845_v5  ;;  %v1498_v51 = vcombine.high %v1482_v47, %v1482_v47  ;;  %v1499_v54 = vcombine.high %v1489_v45, %v1489_v45  ;;  %v1573_v55 = vrot.slane %v1489_v45, %v2849_v18 }
 0x3f2   :  { %v1577_v56 = vrot.slane %v1497_v48, %v2849_v18  ;;  %v1585_v57 = vrot.slane %v1482_v47, %v2849_v18  ;;  %v1517_v58 = vcombine.high %v1515_v50, %v1515_v50  ;;  %v1646_v60 = vsel %vm139_vm4, %v1475_v35, %v1569_v49 }
 0x3f3   :  { %v1500_v4 = vcombine.high %v1496_v53, %v1496_v53  ;;  %v1581_v8 = vrot.slane %v1499_v54, %v2849_v18  ;;  %v1589_v10 = vrot.slane %v1496_v53, %v2849_v18  ;;  %v1593_v15 = vrot.slane %v1498_v51, %v2849_v18 }
 0x3f4   :  { %v1647_v62 = vsel %vm139_vm4, %v1489_v45, %v1573_v55  ;;  %v1648_v61 = vsel %vm139_vm4, %v1497_v48, %v1577_v56  ;;  %v1531_v9 = vrot.slane %v1515_v50, %v2845_v5  ;;  %v1650_v1 = vsel %vm139_vm4, %v1482_v47, %v1585_v57 }
 0x3f5   :  { %v1597_v63 = vrot.slane %v1500_v4, %v2849_v18  ;;  %v1649_v0 = vsel %vm139_vm4, %v1499_v54, %v1581_v8  ;;  %v1651_v2 = vsel %vm139_vm4, %v1496_v53, %v1589_v10  ;;  %v1652_v3 = vsel %vm139_vm4, %v1498_v51, %v1593_v15 }
 0x3f6   :  { %v1678_v7 = vcombine.low %v1646_v60, %v1647_v62  ;;  %v1679_v11 = vcombine.low %v1648_v61, %v1649_v0  ;;  %v1538_v12 = vrot.slane %v1516_v52, %v2845_v5  ;;  %v1545_v16 = vrot.slane %v1517_v58, %v2845_v5 }
 0x3f7   :  { %v1653_v14 = vsel %vm139_vm4, %v1500_v4, %v1597_v63  ;;  %v1546_v17 = vcombine.high %v1524_v59, %v1524_v59  ;;  %v1547_v19 = vcombine.high %v1531_v9, %v1531_v9  ;;  %v1695_v23 = vcombine.low %v1650_v1, %v1651_v2  ;;  %v2466_v2 = vld [vmem:[#allocation4 + $0x150] sm:$0xff]  }
 0x3f8   :  { %v1686_v21 = vrot.slane %v1678_v7, %v2632_v36  ;;  %v1696_v24 = vcombine.low %v1652_v3, %v1653_v14  ;;  %v1548_v25 = vcombine.high %v1538_v12, %v1538_v12  ;;  %v1549_v26 = vcombine.high %v1545_v16, %v1545_v16  ;;  %v2467_v7 = vld [vmem:[#allocation4 + $0x158] sm:$0xff]  }
 0x3f9   :  { %v1601_v27 = vrot.slane %v1524_v59, %v2849_v18  ;;  %v1605_v28 = vrot.slane %v1538_v12, %v2849_v18  ;;  %v1609_v6 = vrot.slane %v1546_v17, %v2849_v18  ;;  %v1617_v31 = vrot.slane %v1531_v9, %v2849_v18 }
 0x3fa   :  { %v1613_v30 = vrot.slane %v1548_v25, %v2849_v18  ;;  %v1621_v5 = vrot.slane %v1545_v16, %v2849_v18  ;;  %v1625_v29 = vrot.slane %v1547_v19, %v2849_v18  ;;  %v1629_v22 = vrot.slane %v1549_v26, %v2849_v18 }
 0x3fb   :  { %v1654_v32 = vsel %vm139_vm4, %v1524_v59, %v1601_v27  ;;  %v1655_v34 = vsel %vm139_vm4, %v1538_v12, %v1605_v28  ;;  %v1656_v37 = vsel %vm139_vm4, %v1546_v17, %v1609_v6  ;;  %v1658_v39 = vsel %vm139_vm4, %v1531_v9, %v1617_v31  ;;  %v2465_v9 = vld [vmem:[#allocation4 + $0x148] sm:$0xff]   ;;  %v2470_v6 = vld [vmem:[#allocation4 + $0x170] sm:$0xff]  }
 0x3fc   :  { %v1657_v38 = vsel %vm139_vm4, %v1548_v25, %v1613_v30  ;;  %v1659_v40 = vsel %vm139_vm4, %v1545_v16, %v1621_v5  ;;  %v1660_v41 = vsel %vm139_vm4, %v1547_v19, %v1625_v29  ;;  %v1661_v20 = vsel %vm139_vm4, %v1549_v26, %v1629_v22  ;;  %v2469_v27 = vld [vmem:[#allocation4 + $0x168] sm:$0xff]   ;;  %v2471_v30 = vld [vmem:[#allocation4 + $0x178] sm:$0xff]  }
 0x3fd   :  { %v1712_v33 = vcombine.low %v1654_v32, %v1655_v34  ;;  %v1713_v42 = vcombine.low %v1656_v37, %v1657_v38  ;;  %v1729_v35 = vcombine.low %v1658_v39, %v1659_v40  ;;  %v1703_v18 = vrot.slane %v1695_v23, %v2632_v36  ;;  %v2148_v37 = vld [vmem:[#allocation6 + $0x3] ss:$0 sm:$0xff] }
 0x3fe   :  { %v1730_v43 = vcombine.low %v1660_v41, %v1661_v20  ;;  %v1693_v44 = vrot.slane %v1679_v11, %v2632_v36  ;;  %v1710_v46 = vrot.slane %v1696_v24, %v2632_v36 }
 0x3ff   :  { %v1720_v47 = vrot.slane %v1712_v33, %v2632_v36  ;;  %v1727_v45 = vrot.slane %v1713_v42, %v2632_v36  ;;  %v1737_v48 = vrot.slane %v1729_v35, %v2632_v36 }
 0x400   :  { %v1744_v49 = vrot.slane %v1730_v43, %v2632_v36  ;;  %v1694_v50 = vcombine.low %v1686_v21, %v1693_v44  ;;  %v1711_v52 = vcombine.low %v1703_v18, %v1710_v46  ;;  %v2468_v21 = vld [vmem:[#allocation4 + $0x160] sm:$0xff]  }
 0x401   :  { %v1728_v53 = vcombine.low %v1720_v47, %v1727_v45 }
 0x402   :  { %v1745_v51 = vcombine.low %v1737_v48, %v1744_v49  ;;  %v1746_v54 = vrot.slane %v1694_v50, 7  ;;  %v1747_v55 = vrot.slane %v1711_v52, 7 }
 0x403   :  { %v1749_v56 = vrot.slane %v1728_v53, 7 }
 0x404   :  { %v1750_v57 = vrot.slane %v1745_v51, 7  ;;  %v1748_v58 = vsel %vm139_vm4, %v1746_v54, %v1747_v55  ;;  %v1758_v59 = vsel %vm139_vm4, 0.0, %v1746_v54  ;;  %v1760_v4 = vsel %vm139_vm4, %v1747_v55, 0.0 }
 0x405   :  { %v1764_v8 = vpack.c.bf16 %v1748_v58, %v1758_v59  ;;  %v1869_v10 = vrot.slane %v1748_v58, 1  ;;  %v1868_v15 = vrot.slane %v1758_v59, 1  ;;  %v1759_v36 = vsel %vm139_vm4, 0.0, %v1749_v56 }
 0x406   :  { %v1751_v60 = vsel %vm139_vm4, %v1749_v56, %v1750_v57  ;;  %v1871_v62 = vrot.slane %v1760_v4, 1  ;;  %v1761_v3 = vsel %vm139_vm4, %v1750_v57, 0.0  ;;  %v1977_v14 = vrot.slane %v1748_v58, 2 }
 0x407   :  { %2340 = vmatprep.mubr.msk.bf16.mxu1 %vm375_vm12, %v1764_v8  ;;  %v1765_v61 = vpack.c.bf16 %v1751_v60, %v1759_v36  ;;  %v1870_v63 = vsel %vm1270_vm13, %v1868_v15, %v1869_v10  ;;  %v1874_v11 = vrot.slane %v1751_v60, 1  ;;  %v1876_v12 = vrot.slane %v1761_v3, 1 }
 0x408   :  { %v1872_v0 = vsel %vm1270_vm13, %v1869_v10, %v1871_v62  ;;  %v1979_v16 = vrot.slane %v1760_v4, 2  ;;  %v1873_v17 = vrot.slane %v1759_v36, 1  ;;  %v1976_v19 = vrot.slane %v1758_v59, 2 }
 0x409   :  { %2341 = vmatmul.mubr.msk.bf16.vlgmr.msra.gmra.mrb[4].mxu1 %vm375_vm12, %v1765_v61  ;;  %v1882_v1 = vpack.c.bf16 %v1872_v0, %v1870_v63  ;;  %v1877_v23 = vsel %vm1270_vm13, %v1874_v11, %v1876_v12  ;;  %v1982_v31 = vrot.slane %v1751_v60, 2  ;;  %v1984_v5 = vrot.slane %v1761_v3, 2 }
 0x40a   :  { %2345 = vmatpush3.bf16.msra.mxu1 %v2898_v13  ;;  %v1875_v13 = vsel %vm1270_vm13, %v1873_v17, %v1874_v11  ;;  %v1978_v24 = vsel %vm1359_vm14, %v1976_v19, %v1977_v14  ;;  %v1980_v25 = vsel %vm1359_vm14, %v1977_v14, %v1979_v16  ;;  %v1981_v29 = vrot.slane %v1759_v36, 2 }
 0x40b   :  { %2352 = vmatprep.mubr.msk.bf16.mxu1 %vm375_vm12, %v1882_v1  ;;  %2346 = vmatprep.subr.bf16.mxu1 %v2465_v9  ;;  %v1883_v26 = vpack.c.bf16 %v1877_v23, %v1875_v13  ;;  %v1990_v28 = vpack.c.bf16 %v1980_v25, %v1978_v24  ;;  %v1985_v32 = vsel %vm1359_vm14, %v1982_v31, %v1984_v5 }
 0x40c   :  { %v1983_v22 = vsel %vm1359_vm14, %v1981_v29, %v1982_v31 }
 0x40d   :  { %v1991_v34 = vpack.c.bf16 %v1985_v32, %v1983_v22 }
 0x40e   :  { %2347 = vmatpush3.bf16.msra.mxu1 %v2465_v9 }
 0x40f   :  { %2348 = vmatprep.subr.bf16.mxu1 %v2466_v2 }
 0x412   :  { %2349 = vmatpush3.bf16.msra.mxu1 %v2466_v2 }
 0x413   :  { %2350 = vmatprep.subr.bf16.mxu1 %v2467_v7 }
 0x416   :  { %2351 = vmatpush3.bf16.msra.mxu1 %v2467_v7 }
 0x417   :  { %2356 = vmatprep.subr.bf16.mxu1 %v2468_v21 }
 0x419   :  { %2353 = vmatmul.mubr.msk.bf16.vlgmr.msra.gmra.mrb[4].mxu1 %vm375_vm12, %v1883_v26 }
 0x41a   :  { %2357 = vmatpush3.bf16.msra.mxu1 %v2468_v21  ;;  %2364 = vmatprep.mubr.msk.bf16.mxu1 %vm375_vm12, %v1990_v28 }
 0x41b   :  { %2358 = vmatprep.subr.bf16.mxu1 %v2469_v27 }
 0x41e   :  { %2359 = vmatpush3.bf16.msra.mxu1 %v2469_v27 }
 0x41f   :  { %2360 = vmatprep.subr.bf16.mxu1 %v2470_v6 }
 0x422   :  { %2361 = vmatpush3.bf16.msra.mxu1 %v2470_v6 }
 0x423   :  { %2362 = vmatprep.subr.bf16.mxu1 %v2471_v30 }
 0x426   :  { %2363 = vmatpush3.bf16.msra.mxu1 %v2471_v30 }
 0x429   :  { %2365 = vmatmul.mubr.msk.bf16.vlgmr.msra.gmra.mrb[4].mxu1 %vm375_vm12, %v1991_v34 }
 0x4fc   :  { %v2366_v38 = vpop.f32.mrb[4].mxu1 }
 0x4fd   :  { %v2373_v39 = vadd.f32 %v2366_v38, %v2148_v37  ;;  %v2065_v40 = vpop.f32.mrb[5].mxu1 }
 0x4fe   :  { %v2374_v41 = vadd.f32 %v2148_v37, %v2065_v40  ;;  %v2367_v20 = vpop.f32.mrb[6].mxu1 }
 0x4ff   :  { %2086 = vst.msk [vmem:[%s2993_s3 + $0x10] sm:$0xff] %vm375_vm12, %v2373_v39  ;;  %v2375_v33 = vadd.f32 %v2367_v20, %v2148_v37  ;;  %v2068_v42 = vpop.f32.mrb[7].mxu1 }
 0x500   :  { %2084 = vst.msk [vmem:[%s2993_s3] sm:$0xff] %vm375_vm12, %v2374_v41  ;;  %v2376_v35 = vadd.f32 %v2148_v37, %v2068_v42 }
 0x501   :  { %2087 = vst.msk [vmem:[%s2993_s3 + $0x18] sm:$0xff] %vm375_vm12, %v2375_v33 }
 0x502   :  { %2085 = vst.msk [vmem:[%s2993_s3 + $0x8] sm:$0xff] %vm375_vm12, %v2376_v35 }
 0x503   :  { %2092 = vsyncpa [#allocation3], 1 }
 0x504   :  { %2093 = vsyncpa [#allocation5], 1 }

</bundles_post_ra>
